<compile_context>
chip_gen: v6e
topology: v6e:2x2x1
jax: 0.10.0
libtpu: 0.0.40
codegen_flags: <defaults>
</compile_context>

<pallas_src>
import functools

import jax
import jax.numpy as jnp
from jax.experimental import pallas as pl
from jax.experimental.pallas import tpu as pltpu

# Small, module-consistent config (module defaults are emb=768, heads=12,
# ff=3072, depth=12 -- scaled down here, same structure).
BATCH = 2
SEQ = 8
EMB = 128
HEADS = 4
FF = 256
DEPTH = 2
LN_EPS = 1e-5


def _layer_norm(v, gamma, beta):
    mu = jnp.mean(v, axis=-1, keepdims=True)
    var = jnp.mean((v - mu) * (v - mu), axis=-1, keepdims=True)
    return (v - mu) * jax.lax.rsqrt(var + LN_EPS) * gamma + beta


def vit_stack_kernel(x_ref, wa_ref, w2_ref, vec_ref, o_ref, *, num_heads, emb, ff):
    e = emb
    bb, s, _ = o_ref.shape
    dh = e // num_heads
    rows = bb * s

    # Seed the resident output block with the input at the first layer; it stays
    # in VMEM across the whole depth axis (persistent activation buffer).
    @pl.when(pl.program_id(1) == 0)
    def _():
        o_ref[...] = x_ref[...]

    x = o_ref[...].reshape(rows, e).astype(jnp.float32)   # f32 activations

    # --- unpack packed per-layer params (all slice offsets lane-aligned) -----
    # bf16 weight slab: [ Wqkv | Wo | W1 ] along the lane axis.
    wqkv = wa_ref[:, 0:3 * e]                       # (E, 3E)  Q slice pre-scaled
    w1 = wa_ref[:, 4 * e:4 * e + ff]                # (E, FF)
    w2 = w2_ref[...]                                # (FF, E)
    # f32 vector slab: [ bqkv | bo | ln1_g | ln1_b | ln2_g | ln2_b | b1 | b2 ].
    bqkv = vec_ref[:, 0:3 * e]                      # (1, 3E)
    bo = vec_ref[:, 3 * e:4 * e]                    # (1, E)
    ln1_g = vec_ref[:, 4 * e:5 * e]
    ln1_b = vec_ref[:, 5 * e:6 * e]
    ln2_g = vec_ref[:, 6 * e:7 * e]
    ln2_b = vec_ref[:, 7 * e:8 * e]
    b1 = vec_ref[:, 8 * e:8 * e + ff]               # (1, FF)
    b2 = vec_ref[:, 8 * e + ff:9 * e + ff]          # (1, E)

    # --- self-attention block (pre-norm) -------------------------------------
    xn = _layer_norm(x, ln1_g, ln1_b)
    qkv = jnp.dot(xn.astype(jnp.bfloat16), wqkv,
                  preferred_element_type=jnp.float32) + bqkv            # (R, 3E)

    attn = jnp.zeros((rows, e), jnp.float32)
    for h in range(num_heads):
        lo = h * dh
        # Slice each head directly out of the fused QKV result (offsets are
        # multiples of dh; no intermediate full Q/K/V tensors materialized).
        qh = qkv[:, lo:lo + dh].reshape(bb, s, dh).astype(jnp.bfloat16)          # scaled Q
        kh = qkv[:, e + lo:e + lo + dh].reshape(bb, s, dh).astype(jnp.bfloat16)
        vh = qkv[:, 2 * e + lo:2 * e + lo + dh].reshape(bb, s, dh).astype(jnp.bfloat16)

        sc = jnp.einsum('bqd,bkd->bqk', qh, kh,
                        preferred_element_type=jnp.float32)              # (B, S, S)
        sc = sc - jnp.max(sc, axis=-1, keepdims=True)
        p = jnp.exp(sc)
        p = p * pl.reciprocal(jnp.sum(p, axis=-1, keepdims=True), approx=True)
        ctx = jnp.einsum('bqk,bkd->bqd', p.astype(jnp.bfloat16), vh,
                         preferred_element_type=jnp.float32)             # (B, S, Dh)

        # Accumulate this head's contribution through its slice of Wo;
        # equivalent to concat(heads) @ Wo without the lane-axis concatenate.
        wo_h = wa_ref[lo:lo + dh, 3 * e:4 * e]                           # (Dh, E) bf16
        attn = attn + jnp.dot(ctx.reshape(rows, dh).astype(jnp.bfloat16),
                              wo_h, preferred_element_type=jnp.float32)
    x = x + attn + bo                                # residual (dropout: eval mode)

    # --- feed-forward block (pre-norm) ----------------------------------------
    xn2 = _layer_norm(x, ln2_g, ln2_b)
    h1 = jnp.dot(xn2.astype(jnp.bfloat16), w1,
                 preferred_element_type=jnp.float32) + b1
    h1 = jnp.maximum(h1, 0.0)                        # default activation = relu
    y = jnp.dot(h1.astype(jnp.bfloat16), w2,
                preferred_element_type=jnp.float32) + b2
    x = x + y

    o_ref[...] = x.reshape(bb, s, e).astype(o_ref.dtype)


@functools.partial(jax.jit, static_argnames=())
def vision_transformer_forward(x, stacked):
    b, s, e = x.shape
    depth = stacked["wa"].shape[0]
    wtot = stacked["wa"].shape[2]
    ff = stacked["w2"].shape[1]
    vtot = stacked["vec"].shape[2]

    # Whole batch per block at this tiny size (maximizes MXU M = B*S).  For big
    # batches, shrink bb to expose the leading "parallel" axis to the 2nd core.
    bb = b

    kernel = functools.partial(vit_stack_kernel, num_heads=HEADS, emb=e, ff=ff)

    return pl.pallas_call(
        kernel,
        out_shape=jax.ShapeDtypeStruct((b, s, e), x.dtype),
        grid=(b // bb, depth),
        in_specs=[
            pl.BlockSpec((bb, s, e), lambda nb, d: (nb, 0, 0)),      # x (fetched once / block)
            pl.BlockSpec((None, e, wtot), lambda nb, d: (d, 0, 0)),  # [Wqkv|Wo|W1] bf16
            pl.BlockSpec((None, ff, e), lambda nb, d: (d, 0, 0)),    # W2 bf16
            pl.BlockSpec((None, 1, vtot), lambda nb, d: (d, 0, 0)),  # packed biases/LN f32
        ],
        out_specs=pl.BlockSpec((bb, s, e), lambda nb, d: (nb, 0, 0)),
        compiler_params=pltpu.CompilerParams(
            dimension_semantics=("parallel", "arbitrary"),
            vmem_limit_bytes=64 * 1024 * 1024),
    )(x, stacked["wa"], stacked["w2"], stacked["vec"])


def init_and_pack_params(key, depth, emb, heads, ff):
    """Build per-layer params (PyTorch-equivalent, pre-transposed to (in, out))
    and pack them into depth-stacked slabs consumed by the fused kernel."""
    dh = emb // heads
    scale_q = 1.0 / jnp.sqrt(jnp.float32(dh))
    std = 0.02
    was, w2s, vecs = [], [], []
    for d in range(depth):
        kd = jax.random.fold_in(key, d)
        k0, k1, k2, k3 = jax.random.split(kd, 4)
        wqkv = jax.random.normal(k0, (emb, 3 * emb), jnp.float32) * std
        wo = jax.random.normal(k1, (emb, emb), jnp.float32) * std
        w1 = jax.random.normal(k2, (emb, ff), jnp.float32) * std
        w2 = jax.random.normal(k3, (ff, emb), jnp.float32) * std
        bqkv = jnp.zeros((3 * emb,), jnp.float32)
        bo = jnp.zeros((emb,), jnp.float32)
        b1 = jnp.zeros((ff,), jnp.float32)
        b2 = jnp.zeros((emb,), jnp.float32)
        ln1_g = jnp.ones((emb,), jnp.float32)
        ln1_b = jnp.zeros((emb,), jnp.float32)
        ln2_g = jnp.ones((emb,), jnp.float32)
        ln2_b = jnp.zeros((emb,), jnp.float32)

        # Fold the 1/sqrt(dh) attention scale into the Q projection (host-side).
        wqkv = wqkv.at[:, :emb].multiply(scale_q)
        bqkv = bqkv.at[:emb].multiply(scale_q)

        was.append(jnp.concatenate([wqkv, wo, w1], axis=1).astype(jnp.bfloat16))
        w2s.append(w2.astype(jnp.bfloat16))
        vecs.append(jnp.concatenate(
            [bqkv, bo, ln1_g, ln1_b, ln2_g, ln2_b, b1, b2])[None, :])
    return {
        "wa": jnp.stack(was),     # (DEPTH, E, 3E+E+FF) bf16
        "w2": jnp.stack(w2s),     # (DEPTH, FF, E)      bf16
        "vec": jnp.stack(vecs),   # (DEPTH, 1, 9E+FF)   f32
    }


if __name__ == "__main__":
    root = jax.random.PRNGKey(0)
    k_x, k_p = jax.random.split(root)

    # Input matches what VisionTransformer.forward consumes: (B, S, E).
    x = jax.random.normal(k_x, (BATCH, SEQ, EMB), jnp.float32)
    params = init_and_pack_params(k_p, DEPTH, EMB, HEADS, FF)

    out = vision_transformer_forward(x, params)
    out = jax.block_until_ready(out)
    assert out.shape == (BATCH, SEQ, EMB)
    assert bool(jnp.all(jnp.isfinite(out)))
    print("KERNEL_OK")
</pallas_src>

<mosaic_0001>
module attributes {stable_mosaic.version = 11 : i64} {
  func.func @vit_stack_kernel(%arg0: i32, %arg1: i32, %arg2: memref<2x8x128xf32, #tpu.memory_space<vmem>>, %arg3: memref<1x128x768xbf16, #tpu.memory_space<vmem>>, %arg4: memref<1x256x128xbf16, #tpu.memory_space<vmem>>, %arg5: memref<1x1x1408xf32, #tpu.memory_space<vmem>>, %arg6: memref<2x8x128xf32, #tpu.memory_space<vmem>>) attributes {dimension_semantics = [#tpu.dimension_semantics<parallel>, #tpu.dimension_semantics<arbitrary>], iteration_bounds = array<i64: 1, 2>, scalar_prefetch = 0 : i64, scratch_operands = 0 : i64, tpu.core_type = #tpu.core_type<tc>, window_params = [{transform_indices = @transform_0, window_bounds = array<i64: 2, 8, 128>}, {transform_indices = @transform_1, window_bounds = array<i64: 1, 128, 768>}, {transform_indices = @transform_2, window_bounds = array<i64: 1, 256, 128>}, {transform_indices = @transform_3, window_bounds = array<i64: 1, 1, 1408>}, {transform_indices = @transform_4, window_bounds = array<i64: 2, 8, 128>}]} {
    %c0_i32 = arith.constant 0 : i32
    %0 = arith.cmpi eq, %arg1, %c0_i32 : i32
    %1 = arith.extui %0 : i1 to i32
    %c0_i32_0 = arith.constant 0 : i32
    %2 = arith.cmpi ne, %1, %c0_i32_0 : i32
    scf.if %2 {
      %c0_75 = arith.constant 0 : index
      %c0_76 = arith.constant 0 : index
      %c0_77 = arith.constant 0 : index
      %208 = vector.load %arg2[%c0_75, %c0_76, %c0_77] : memref<2x8x128xf32, #tpu.memory_space<vmem>>, vector<2x8x128xf32>
      %c0_78 = arith.constant 0 : index
      %c0_79 = arith.constant 0 : index
      %c0_80 = arith.constant 0 : index
      %209 = vector.load %arg6[%c0_78, %c0_79, %c0_80] : memref<2x8x128xf32, #tpu.memory_space<vmem>>, vector<2x8x128xf32>
      tpu.vector_store %arg6[%c0_78, %c0_79, %c0_80], %208 {strides = array<i32>} : memref<2x8x128xf32, #tpu.memory_space<vmem>>, vector<2x8x128xf32>,
    } else {
    }
    %c0 = arith.constant 0 : index
    %c0_1 = arith.constant 0 : index
    %c0_2 = arith.constant 0 : index
    %3 = vector.load %arg6[%c0, %c0_1, %c0_2] : memref<2x8x128xf32, #tpu.memory_space<vmem>>, vector<2x8x128xf32>
    %4 = vector.shape_cast %3 : vector<2x8x128xf32> to vector<16x128xf32>
    %c0_3 = arith.constant 0 : index
    %c0_4 = arith.constant 0 : index
    %c0_5 = arith.constant 0 : index
    %5 = vector.load %arg3[%c0_3, %c0_4, %c0_5] : memref<1x128x768xbf16, #tpu.memory_space<vmem>>, vector<1x128x384xbf16>
    %6 = vector.shape_cast %5 : vector<1x128x384xbf16> to vector<128x384xbf16>
    %c0_6 = arith.constant 0 : index
    %c0_7 = arith.constant 0 : index
    %c512 = arith.constant 512 : index
    %7 = vector.load %arg3[%c0_6, %c0_7, %c512] : memref<1x128x768xbf16, #tpu.memory_space<vmem>>, vector<1x128x256xbf16>
    %8 = vector.shape_cast %7 : vector<1x128x256xbf16> to vector<128x256xbf16>
    %c0_8 = arith.constant 0 : index
    %c0_9 = arith.constant 0 : index
    %c0_10 = arith.constant 0 : index
    %9 = vector.load %arg4[%c0_8, %c0_9, %c0_10] : memref<1x256x128xbf16, #tpu.memory_space<vmem>>, vector<1x256x128xbf16>
    %10 = vector.shape_cast %9 : vector<1x256x128xbf16> to vector<256x128xbf16>
    %c0_11 = arith.constant 0 : index
    %c0_12 = arith.constant 0 : index
    %c0_13 = arith.constant 0 : index
    %11 = vector.load %arg5[%c0_11, %c0_12, %c0_13] : memref<1x1x1408xf32, #tpu.memory_space<vmem>>, vector<1x1x384xf32>
    %12 = vector.shape_cast %11 : vector<1x1x384xf32> to vector<1x384xf32>
    %c0_14 = arith.constant 0 : index
    %c0_15 = arith.constant 0 : index
    %c384 = arith.constant 384 : index
    %13 = vector.load %arg5[%c0_14, %c0_15, %c384] : memref<1x1x1408xf32, #tpu.memory_space<vmem>>, vector<1x1x128xf32>
    %14 = vector.shape_cast %13 : vector<1x1x128xf32> to vector<1x128xf32>
    %c0_16 = arith.constant 0 : index
    %c0_17 = arith.constant 0 : index
    %c512_18 = arith.constant 512 : index
    %15 = vector.load %arg5[%c0_16, %c0_17, %c512_18] : memref<1x1x1408xf32, #tpu.memory_space<vmem>>, vector<1x1x128xf32>
    %16 = vector.shape_cast %15 : vector<1x1x128xf32> to vector<1x128xf32>
    %c0_19 = arith.constant 0 : index
    %c0_20 = arith.constant 0 : index
    %c640 = arith.constant 640 : index
    %17 = vector.load %arg5[%c0_19, %c0_20, %c640] : memref<1x1x1408xf32, #tpu.memory_space<vmem>>, vector<1x1x128xf32>
    %18 = vector.shape_cast %17 : vector<1x1x128xf32> to vector<1x128xf32>
    %c0_21 = arith.constant 0 : index
    %c0_22 = arith.constant 0 : index
    %c768 = arith.constant 768 : index
    %19 = vector.load %arg5[%c0_21, %c0_22, %c768] : memref<1x1x1408xf32, #tpu.memory_space<vmem>>, vector<1x1x128xf32>
    %20 = vector.shape_cast %19 : vector<1x1x128xf32> to vector<1x128xf32>
    %c0_23 = arith.constant 0 : index
    %c0_24 = arith.constant 0 : index
    %c896 = arith.constant 896 : index
    %21 = vector.load %arg5[%c0_23, %c0_24, %c896] : memref<1x1x1408xf32, #tpu.memory_space<vmem>>, vector<1x1x128xf32>
    %22 = vector.shape_cast %21 : vector<1x1x128xf32> to vector<1x128xf32>
    %c0_25 = arith.constant 0 : index
    %c0_26 = arith.constant 0 : index
    %c1024 = arith.constant 1024 : index
    %23 = vector.load %arg5[%c0_25, %c0_26, %c1024] : memref<1x1x1408xf32, #tpu.memory_space<vmem>>, vector<1x1x256xf32>
    %24 = vector.shape_cast %23 : vector<1x1x256xf32> to vector<1x256xf32>
    %c0_27 = arith.constant 0 : index
    %c0_28 = arith.constant 0 : index
    %c1280 = arith.constant 1280 : index
    %25 = vector.load %arg5[%c0_27, %c0_28, %c1280] : memref<1x1x1408xf32, #tpu.memory_space<vmem>>, vector<1x1x128xf32>
    %26 = vector.shape_cast %25 : vector<1x1x128xf32> to vector<1x128xf32>
    %cst = arith.constant dense<0.000000e+00> : vector<16xf32>
    %27 = vector.multi_reduction <add>, %4, %cst [1] : vector<16x128xf32> to vector<16xf32>
    %28 = vector.shape_cast %27 : vector<16xf32> to vector<16x1xf32>
    %cst_29 = arith.constant 1.280000e+02 : f32
    %29 = vector.broadcast %cst_29 : f32 to vector<16x1xf32>
    %30 = arith.divf %28, %29 : vector<16x1xf32>
    %31 = vector.broadcast %30 : vector<16x1xf32> to vector<16x128xf32>
    %32 = arith.subf %4, %31 : vector<16x128xf32>
    %33 = vector.broadcast %30 : vector<16x1xf32> to vector<16x128xf32>
    %34 = arith.subf %4, %33 : vector<16x128xf32>
    %35 = arith.mulf %32, %34 : vector<16x128xf32>
    %cst_30 = arith.constant dense<0.000000e+00> : vector<16xf32>
    %36 = vector.multi_reduction <add>, %35, %cst_30 [1] : vector<16x128xf32> to vector<16xf32>
    %37 = vector.shape_cast %36 : vector<16xf32> to vector<16x1xf32>
    %cst_31 = arith.constant 1.280000e+02 : f32
    %38 = vector.broadcast %cst_31 : f32 to vector<16x1xf32>
    %39 = arith.divf %37, %38 : vector<16x1xf32>
    %40 = vector.broadcast %30 : vector<16x1xf32> to vector<16x128xf32>
    %41 = arith.subf %4, %40 : vector<16x128xf32>
    %cst_32 = arith.constant 9.99999974E-6 : f32
    %42 = vector.broadcast %cst_32 : f32 to vector<16x1xf32>
    %43 = arith.addf %39, %42 : vector<16x1xf32>
    %44 = math.rsqrt %43 : vector<16x1xf32>
    %45 = vector.broadcast %44 : vector<16x1xf32> to vector<16x128xf32>
    %46 = arith.mulf %41, %45 : vector<16x128xf32>
    %47 = vector.broadcast %16 : vector<1x128xf32> to vector<16x128xf32>
    %48 = arith.mulf %46, %47 : vector<16x128xf32>
    %49 = vector.broadcast %18 : vector<1x128xf32> to vector<16x128xf32>
    %50 = arith.addf %48, %49 : vector<16x128xf32>
    %51 = arith.truncf %50 : vector<16x128xf32> to vector<16x128xbf16>
    %cst_33 = arith.constant dense<0.000000e+00> : vector<16x384xf32>
    %52 = tpu.matmul %51, %6, %cst_33 {dimension_numbers = #tpu.dot_dimension_numbers<[1], [0], [0], [1], [0, 0, 1, 1], [], []>} : vector<16x128xbf16>, vector<128x384xbf16>, vector<16x384xf32> -> vector<16x384xf32>
    %53 = vector.broadcast %12 : vector<1x384xf32> to vector<16x384xf32>
    %54 = arith.addf %52, %53 : vector<16x384xf32>
    %cst_34 = arith.constant 0.000000e+00 : f32
    %55 = vector.broadcast %cst_34 : f32 to vector<16x128xf32>
    %56 = vector.extract_strided_slice %54 {offsets = [0, 0], sizes = [16, 32], strides = [1, 1]} : vector<16x384xf32> to vector<16x32xf32>
    %57 = vector.shape_cast %56 : vector<16x32xf32> to vector<2x8x32xf32>
    %58 = arith.truncf %57 : vector<2x8x32xf32> to vector<2x8x32xbf16>
    %59 = vector.extract_strided_slice %54 {offsets = [0, 128], sizes = [16, 32], strides = [1, 1]} : vector<16x384xf32> to vector<16x32xf32>
    %60 = vector.shape_cast %59 : vector<16x32xf32> to vector<2x8x32xf32>
    %61 = arith.truncf %60 : vector<2x8x32xf32> to vector<2x8x32xbf16>
    %62 = vector.extract_strided_slice %54 {offsets = [0, 256], sizes = [16, 32], strides = [1, 1]} : vector<16x384xf32> to vector<16x32xf32>
    %63 = vector.shape_cast %62 : vector<16x32xf32> to vector<2x8x32xf32>
    %64 = arith.truncf %63 : vector<2x8x32xf32> to vector<2x8x32xbf16>
    "tpu.trace_start"() <{level = 10 : i32, message = "bqd,bkd->bqk"}> : () -> ()
    %cst_35 = arith.constant dense<0.000000e+00> : vector<2x8x8xf32>
    %65 = tpu.matmul %58, %61, %cst_35 {dimension_numbers = #tpu.dot_dimension_numbers<[2], [2], [1], [1], [0, 0, 0, 1, 1, 1], [0], [0]>} : vector<2x8x32xbf16>, vector<2x8x32xbf16>, vector<2x8x8xf32> -> vector<2x8x8xf32>
    "tpu.trace_stop"() : () -> ()
    %cst_36 = arith.constant dense<0xFF800000> : vector<2x8xf32>
    %66 = vector.multi_reduction <maximumf>, %65, %cst_36 [2] : vector<2x8x8xf32> to vector<2x8xf32>
    %67 = vector.shape_cast %66 : vector<2x8xf32> to vector<2x8x1xf32>
    %68 = vector.broadcast %67 : vector<2x8x1xf32> to vector<2x8x8xf32>
    %69 = arith.subf %65, %68 : vector<2x8x8xf32>
    %70 = math.exp %69 : vector<2x8x8xf32>
    %cst_37 = arith.constant dense<0.000000e+00> : vector<2x8xf32>
    %71 = vector.multi_reduction <add>, %70, %cst_37 [2] : vector<2x8x8xf32> to vector<2x8xf32>
    %72 = vector.shape_cast %71 : vector<2x8xf32> to vector<2x8x1xf32>
    %73 = tpu.reciprocal %72 {approx = true} : vector<2x8x1xf32> -> vector<2x8x1xf32>
    %74 = vector.broadcast %73 : vector<2x8x1xf32> to vector<2x8x8xf32>
    %75 = arith.mulf %70, %74 : vector<2x8x8xf32>
    %76 = arith.truncf %75 : vector<2x8x8xf32> to vector<2x8x8xbf16>
    "tpu.trace_start"() <{level = 10 : i32, message = "bqk,bkd->bqd"}> : () -> ()
    %cst_38 = arith.constant dense<0.000000e+00> : vector<2x8x32xf32>
    %77 = tpu.matmul %76, %64, %cst_38 {dimension_numbers = #tpu.dot_dimension_numbers<[2], [1], [1], [2], [0, 0, 0, 1, 1, 2], [0], [0]>} : vector<2x8x8xbf16>, vector<2x8x32xbf16>, vector<2x8x32xf32> -> vector<2x8x32xf32>
    "tpu.trace_stop"() : () -> ()
    %c0_39 = arith.constant 0 : index
    %c0_40 = arith.constant 0 : index
    %c384_41 = arith.constant 384 : index
    %78 = vector.load %arg3[%c0_39, %c0_40, %c384_41] : memref<1x128x768xbf16, #tpu.memory_space<vmem>>, vector<1x32x128xbf16>
    %79 = vector.shape_cast %78 : vector<1x32x128xbf16> to vector<32x128xbf16>
    %80 = vector.shape_cast %77 : vector<2x8x32xf32> to vector<16x32xf32>
    %81 = arith.truncf %80 : vector<16x32xf32> to vector<16x32xbf16>
    %cst_42 = arith.constant dense<0.000000e+00> : vector<16x128xf32>
    %82 = tpu.matmul %81, %79, %cst_42 {dimension_numbers = #tpu.dot_dimension_numbers<[1], [0], [0], [1], [0, 0, 1, 1], [], []>} : vector<16x32xbf16>, vector<32x128xbf16>, vector<16x128xf32> -> vector<16x128xf32>
    %83 = arith.addf %55, %82 : vector<16x128xf32>
    %84 = vector.extract_strided_slice %54 {offsets = [0, 32], sizes = [16, 32], strides = [1, 1]} : vector<16x384xf32> to vector<16x32xf32>
    %85 = vector.shape_cast %84 : vector<16x32xf32> to vector<2x8x32xf32>
    %86 = arith.truncf %85 : vector<2x8x32xf32> to vector<2x8x32xbf16>
    %87 = vector.extract_strided_slice %54 {offsets = [0, 160], sizes = [16, 32], strides = [1, 1]} : vector<16x384xf32> to vector<16x32xf32>
    %88 = vector.shape_cast %87 : vector<16x32xf32> to vector<2x8x32xf32>
    %89 = arith.truncf %88 : vector<2x8x32xf32> to vector<2x8x32xbf16>
    %90 = vector.extract_strided_slice %54 {offsets = [0, 288], sizes = [16, 32], strides = [1, 1]} : vector<16x384xf32> to vector<16x32xf32>
    %91 = vector.shape_cast %90 : vector<16x32xf32> to vector<2x8x32xf32>
    %92 = arith.truncf %91 : vector<2x8x32xf32> to vector<2x8x32xbf16>
    "tpu.trace_start"() <{level = 10 : i32, message = "bqd,bkd->bqk"}> : () -> ()
    %cst_43 = arith.constant dense<0.000000e+00> : vector<2x8x8xf32>
    %93 = tpu.matmul %86, %89, %cst_43 {dimension_numbers = #tpu.dot_dimension_numbers<[2], [2], [1], [1], [0, 0, 0, 1, 1, 1], [0], [0]>} : vector<2x8x32xbf16>, vector<2x8x32xbf16>, vector<2x8x8xf32> -> vector<2x8x8xf32>
    "tpu.trace_stop"() : () -> ()
    %cst_44 = arith.constant dense<0xFF800000> : vector<2x8xf32>
    %94 = vector.multi_reduction <maximumf>, %93, %cst_44 [2] : vector<2x8x8xf32> to vector<2x8xf32>
    %95 = vector.shape_cast %94 : vector<2x8xf32> to vector<2x8x1xf32>
    %96 = vector.broadcast %95 : vector<2x8x1xf32> to vector<2x8x8xf32>
    %97 = arith.subf %93, %96 : vector<2x8x8xf32>
    %98 = math.exp %97 : vector<2x8x8xf32>
    %cst_45 = arith.constant dense<0.000000e+00> : vector<2x8xf32>
    %99 = vector.multi_reduction <add>, %98, %cst_45 [2] : vector<2x8x8xf32> to vector<2x8xf32>
    %100 = vector.shape_cast %99 : vector<2x8xf32> to vector<2x8x1xf32>
    %101 = tpu.reciprocal %100 {approx = true} : vector<2x8x1xf32> -> vector<2x8x1xf32>
    %102 = vector.broadcast %101 : vector<2x8x1xf32> to vector<2x8x8xf32>
    %103 = arith.mulf %98, %102 : vector<2x8x8xf32>
    %104 = arith.truncf %103 : vector<2x8x8xf32> to vector<2x8x8xbf16>
    "tpu.trace_start"() <{level = 10 : i32, message = "bqk,bkd->bqd"}> : () -> ()
    %cst_46 = arith.constant dense<0.000000e+00> : vector<2x8x32xf32>
    %105 = tpu.matmul %104, %92, %cst_46 {dimension_numbers = #tpu.dot_dimension_numbers<[2], [1], [1], [2], [0, 0, 0, 1, 1, 2], [0], [0]>} : vector<2x8x8xbf16>, vector<2x8x32xbf16>, vector<2x8x32xf32> -> vector<2x8x32xf32>
    "tpu.trace_stop"() : () -> ()
    %c0_47 = arith.constant 0 : index
    %c32 = arith.constant 32 : index
    %c384_48 = arith.constant 384 : index
    %106 = vector.load %arg3[%c0_47, %c32, %c384_48] : memref<1x128x768xbf16, #tpu.memory_space<vmem>>, vector<1x32x128xbf16>
    %107 = vector.shape_cast %106 : vector<1x32x128xbf16> to vector<32x128xbf16>
    %108 = vector.shape_cast %105 : vector<2x8x32xf32> to vector<16x32xf32>
    %109 = arith.truncf %108 : vector<16x32xf32> to vector<16x32xbf16>
    %cst_49 = arith.constant dense<0.000000e+00> : vector<16x128xf32>
    %110 = tpu.matmul %109, %107, %cst_49 {dimension_numbers = #tpu.dot_dimension_numbers<[1], [0], [0], [1], [0, 0, 1, 1], [], []>} : vector<16x32xbf16>, vector<32x128xbf16>, vector<16x128xf32> -> vector<16x128xf32>
    %111 = arith.addf %83, %110 : vector<16x128xf32>
    %112 = vector.extract_strided_slice %54 {offsets = [0, 64], sizes = [16, 32], strides = [1, 1]} : vector<16x384xf32> to vector<16x32xf32>
    %113 = vector.shape_cast %112 : vector<16x32xf32> to vector<2x8x32xf32>
    %114 = arith.truncf %113 : vector<2x8x32xf32> to vector<2x8x32xbf16>
    %115 = vector.extract_strided_slice %54 {offsets = [0, 192], sizes = [16, 32], strides = [1, 1]} : vector<16x384xf32> to vector<16x32xf32>
    %116 = vector.shape_cast %115 : vector<16x32xf32> to vector<2x8x32xf32>
    %117 = arith.truncf %116 : vector<2x8x32xf32> to vector<2x8x32xbf16>
    %118 = vector.extract_strided_slice %54 {offsets = [0, 320], sizes = [16, 32], strides = [1, 1]} : vector<16x384xf32> to vector<16x32xf32>
    %119 = vector.shape_cast %118 : vector<16x32xf32> to vector<2x8x32xf32>
    %120 = arith.truncf %119 : vector<2x8x32xf32> to vector<2x8x32xbf16>
    "tpu.trace_start"() <{level = 10 : i32, message = "bqd,bkd->bqk"}> : () -> ()
    %cst_50 = arith.constant dense<0.000000e+00> : vector<2x8x8xf32>
    %121 = tpu.matmul %114, %117, %cst_50 {dimension_numbers = #tpu.dot_dimension_numbers<[2], [2], [1], [1], [0, 0, 0, 1, 1, 1], [0], [0]>} : vector<2x8x32xbf16>, vector<2x8x32xbf16>, vector<2x8x8xf32> -> vector<2x8x8xf32>
    "tpu.trace_stop"() : () -> ()
    %cst_51 = arith.constant dense<0xFF800000> : vector<2x8xf32>
    %122 = vector.multi_reduction <maximumf>, %121, %cst_51 [2] : vector<2x8x8xf32> to vector<2x8xf32>
    %123 = vector.shape_cast %122 : vector<2x8xf32> to vector<2x8x1xf32>
    %124 = vector.broadcast %123 : vector<2x8x1xf32> to vector<2x8x8xf32>
    %125 = arith.subf %121, %124 : vector<2x8x8xf32>
    %126 = math.exp %125 : vector<2x8x8xf32>
    %cst_52 = arith.constant dense<0.000000e+00> : vector<2x8xf32>
    %127 = vector.multi_reduction <add>, %126, %cst_52 [2] : vector<2x8x8xf32> to vector<2x8xf32>
    %128 = vector.shape_cast %127 : vector<2x8xf32> to vector<2x8x1xf32>
    %129 = tpu.reciprocal %128 {approx = true} : vector<2x8x1xf32> -> vector<2x8x1xf32>
    %130 = vector.broadcast %129 : vector<2x8x1xf32> to vector<2x8x8xf32>
    %131 = arith.mulf %126, %130 : vector<2x8x8xf32>
    %132 = arith.truncf %131 : vector<2x8x8xf32> to vector<2x8x8xbf16>
    "tpu.trace_start"() <{level = 10 : i32, message = "bqk,bkd->bqd"}> : () -> ()
    %cst_53 = arith.constant dense<0.000000e+00> : vector<2x8x32xf32>
    %133 = tpu.matmul %132, %120, %cst_53 {dimension_numbers = #tpu.dot_dimension_numbers<[2], [1], [1], [2], [0, 0, 0, 1, 1, 2], [0], [0]>} : vector<2x8x8xbf16>, vector<2x8x32xbf16>, vector<2x8x32xf32> -> vector<2x8x32xf32>
    "tpu.trace_stop"() : () -> ()
    %c0_54 = arith.constant 0 : index
    %c64 = arith.constant 64 : index
    %c384_55 = arith.constant 384 : index
    %134 = vector.load %arg3[%c0_54, %c64, %c384_55] : memref<1x128x768xbf16, #tpu.memory_space<vmem>>, vector<1x32x128xbf16>
    %135 = vector.shape_cast %134 : vector<1x32x128xbf16> to vector<32x128xbf16>
    %136 = vector.shape_cast %133 : vector<2x8x32xf32> to vector<16x32xf32>
    %137 = arith.truncf %136 : vector<16x32xf32> to vector<16x32xbf16>
    %cst_56 = arith.constant dense<0.000000e+00> : vector<16x128xf32>
    %138 = tpu.matmul %137, %135, %cst_56 {dimension_numbers = #tpu.dot_dimension_numbers<[1], [0], [0], [1], [0, 0, 1, 1], [], []>} : vector<16x32xbf16>, vector<32x128xbf16>, vector<16x128xf32> -> vector<16x128xf32>
    %139 = arith.addf %111, %138 : vector<16x128xf32>
    %140 = vector.extract_strided_slice %54 {offsets = [0, 96], sizes = [16, 32], strides = [1, 1]} : vector<16x384xf32> to vector<16x32xf32>
    %141 = vector.shape_cast %140 : vector<16x32xf32> to vector<2x8x32xf32>
    %142 = arith.truncf %141 : vector<2x8x32xf32> to vector<2x8x32xbf16>
    %143 = vector.extract_strided_slice %54 {offsets = [0, 224], sizes = [16, 32], strides = [1, 1]} : vector<16x384xf32> to vector<16x32xf32>
    %144 = vector.shape_cast %143 : vector<16x32xf32> to vector<2x8x32xf32>
    %145 = arith.truncf %144 : vector<2x8x32xf32> to vector<2x8x32xbf16>
    %146 = vector.extract_strided_slice %54 {offsets = [0, 352], sizes = [16, 32], strides = [1, 1]} : vector<16x384xf32> to vector<16x32xf32>
    %147 = vector.shape_cast %146 : vector<16x32xf32> to vector<2x8x32xf32>
    %148 = arith.truncf %147 : vector<2x8x32xf32> to vector<2x8x32xbf16>
    "tpu.trace_start"() <{level = 10 : i32, message = "bqd,bkd->bqk"}> : () -> ()
    %cst_57 = arith.constant dense<0.000000e+00> : vector<2x8x8xf32>
    %149 = tpu.matmul %142, %145, %cst_57 {dimension_numbers = #tpu.dot_dimension_numbers<[2], [2], [1], [1], [0, 0, 0, 1, 1, 1], [0], [0]>} : vector<2x8x32xbf16>, vector<2x8x32xbf16>, vector<2x8x8xf32> -> vector<2x8x8xf32>
    "tpu.trace_stop"() : () -> ()
    %cst_58 = arith.constant dense<0xFF800000> : vector<2x8xf32>
    %150 = vector.multi_reduction <maximumf>, %149, %cst_58 [2] : vector<2x8x8xf32> to vector<2x8xf32>
    %151 = vector.shape_cast %150 : vector<2x8xf32> to vector<2x8x1xf32>
    %152 = vector.broadcast %151 : vector<2x8x1xf32> to vector<2x8x8xf32>
    %153 = arith.subf %149, %152 : vector<2x8x8xf32>
    %154 = math.exp %153 : vector<2x8x8xf32>
    %cst_59 = arith.constant dense<0.000000e+00> : vector<2x8xf32>
    %155 = vector.multi_reduction <add>, %154, %cst_59 [2] : vector<2x8x8xf32> to vector<2x8xf32>
    %156 = vector.shape_cast %155 : vector<2x8xf32> to vector<2x8x1xf32>
    %157 = tpu.reciprocal %156 {approx = true} : vector<2x8x1xf32> -> vector<2x8x1xf32>
    %158 = vector.broadcast %157 : vector<2x8x1xf32> to vector<2x8x8xf32>
    %159 = arith.mulf %154, %158 : vector<2x8x8xf32>
    %160 = arith.truncf %159 : vector<2x8x8xf32> to vector<2x8x8xbf16>
    "tpu.trace_start"() <{level = 10 : i32, message = "bqk,bkd->bqd"}> : () -> ()
    %cst_60 = arith.constant dense<0.000000e+00> : vector<2x8x32xf32>
    %161 = tpu.matmul %160, %148, %cst_60 {dimension_numbers = #tpu.dot_dimension_numbers<[2], [1], [1], [2], [0, 0, 0, 1, 1, 2], [0], [0]>} : vector<2x8x8xbf16>, vector<2x8x32xbf16>, vector<2x8x32xf32> -> vector<2x8x32xf32>
    "tpu.trace_stop"() : () -> ()
    %c0_61 = arith.constant 0 : index
    %c96 = arith.constant 96 : index
    %c384_62 = arith.constant 384 : index
    %162 = vector.load %arg3[%c0_61, %c96, %c384_62] : memref<1x128x768xbf16, #tpu.memory_space<vmem>>, vector<1x32x128xbf16>
    %163 = vector.shape_cast %162 : vector<1x32x128xbf16> to vector<32x128xbf16>
    %164 = vector.shape_cast %161 : vector<2x8x32xf32> to vector<16x32xf32>
    %165 = arith.truncf %164 : vector<16x32xf32> to vector<16x32xbf16>
    %cst_63 = arith.constant dense<0.000000e+00> : vector<16x128xf32>
    %166 = tpu.matmul %165, %163, %cst_63 {dimension_numbers = #tpu.dot_dimension_numbers<[1], [0], [0], [1], [0, 0, 1, 1], [], []>} : vector<16x32xbf16>, vector<32x128xbf16>, vector<16x128xf32> -> vector<16x128xf32>
    %167 = arith.addf %139, %166 : vector<16x128xf32>
    %168 = arith.addf %4, %167 : vector<16x128xf32>
    %169 = vector.broadcast %14 : vector<1x128xf32> to vector<16x128xf32>
    %170 = arith.addf %168, %169 : vector<16x128xf32>
    %cst_64 = arith.constant dense<0.000000e+00> : vector<16xf32>
    %171 = vector.multi_reduction <add>, %170, %cst_64 [1] : vector<16x128xf32> to vector<16xf32>
    %172 = vector.shape_cast %171 : vector<16xf32> to vector<16x1xf32>
    %cst_65 = arith.constant 1.280000e+02 : f32
    %173 = vector.broadcast %cst_65 : f32 to vector<16x1xf32>
    %174 = arith.divf %172, %173 : vector<16x1xf32>
    %175 = vector.broadcast %174 : vector<16x1xf32> to vector<16x128xf32>
    %176 = arith.subf %170, %175 : vector<16x128xf32>
    %177 = vector.broadcast %174 : vector<16x1xf32> to vector<16x128xf32>
    %178 = arith.subf %170, %177 : vector<16x128xf32>
    %179 = arith.mulf %176, %178 : vector<16x128xf32>
    %cst_66 = arith.constant dense<0.000000e+00> : vector<16xf32>
    %180 = vector.multi_reduction <add>, %179, %cst_66 [1] : vector<16x128xf32> to vector<16xf32>
    %181 = vector.shape_cast %180 : vector<16xf32> to vector<16x1xf32>
    %cst_67 = arith.constant 1.280000e+02 : f32
    %182 = vector.broadcast %cst_67 : f32 to vector<16x1xf32>
    %183 = arith.divf %181, %182 : vector<16x1xf32>
    %184 = vector.broadcast %174 : vector<16x1xf32> to vector<16x128xf32>
    %185 = arith.subf %170, %184 : vector<16x128xf32>
    %cst_68 = arith.constant 9.99999974E-6 : f32
    %186 = vector.broadcast %cst_68 : f32 to vector<16x1xf32>
    %187 = arith.addf %183, %186 : vector<16x1xf32>
    %188 = math.rsqrt %187 : vector<16x1xf32>
    %189 = vector.broadcast %188 : vector<16x1xf32> to vector<16x128xf32>
    %190 = arith.mulf %185, %189 : vector<16x128xf32>
    %191 = vector.broadcast %20 : vector<1x128xf32> to vector<16x128xf32>
    %192 = arith.mulf %190, %191 : vector<16x128xf32>
    %193 = vector.broadcast %22 : vector<1x128xf32> to vector<16x128xf32>
    %194 = arith.addf %192, %193 : vector<16x128xf32>
    %195 = arith.truncf %194 : vector<16x128xf32> to vector<16x128xbf16>
    %cst_69 = arith.constant dense<0.000000e+00> : vector<16x256xf32>
    %196 = tpu.matmul %195, %8, %cst_69 {dimension_numbers = #tpu.dot_dimension_numbers<[1], [0], [0], [1], [0, 0, 1, 1], [], []>} : vector<16x128xbf16>, vector<128x256xbf16>, vector<16x256xf32> -> vector<16x256xf32>
    %197 = vector.broadcast %24 : vector<1x256xf32> to vector<16x256xf32>
    %198 = arith.addf %196, %197 : vector<16x256xf32>
    %cst_70 = arith.constant 0.000000e+00 : f32
    %199 = vector.broadcast %cst_70 : f32 to vector<16x256xf32>
    %200 = arith.maximumf %198, %199 : vector<16x256xf32>
    %201 = arith.truncf %200 : vector<16x256xf32> to vector<16x256xbf16>
    %cst_71 = arith.constant dense<0.000000e+00> : vector<16x128xf32>
    %202 = tpu.matmul %201, %10, %cst_71 {dimension_numbers = #tpu.dot_dimension_numbers<[1], [0], [0], [1], [0, 0, 1, 1], [], []>} : vector<16x256xbf16>, vector<256x128xbf16>, vector<16x128xf32> -> vector<16x128xf32>
    %203 = vector.broadcast %26 : vector<1x128xf32> to vector<16x128xf32>
    %204 = arith.addf %202, %203 : vector<16x128xf32>
    %205 = arith.addf %170, %204 : vector<16x128xf32>
    %206 = vector.shape_cast %205 : vector<16x128xf32> to vector<2x8x128xf32>
    %c0_72 = arith.constant 0 : index
    %c0_73 = arith.constant 0 : index
    %c0_74 = arith.constant 0 : index
    %207 = vector.load %arg6[%c0_72, %c0_73, %c0_74] : memref<2x8x128xf32, #tpu.memory_space<vmem>>, vector<2x8x128xf32>
    tpu.vector_store %arg6[%c0_72, %c0_73, %c0_74], %206 {strides = array<i32>} : memref<2x8x128xf32, #tpu.memory_space<vmem>>, vector<2x8x128xf32>,
    return
  }
  func.func @transform_0(%arg0: i32, %arg1: i32) -> (i32, i32, i32) {
    %c0_i32 = arith.constant 0 : i32
    %c0_i32_0 = arith.constant 0 : i32
    %c0_i32_1 = arith.constant 0 : i32
    return %arg0, %c0_i32, %c0_i32_0 : i32, i32, i32
  }
  func.func @transform_1(%arg0: i32, %arg1: i32) -> (i32, i32, i32) {
    %c0_i32 = arith.constant 0 : i32
    %c0_i32_0 = arith.constant 0 : i32
    %c0_i32_1 = arith.constant 0 : i32
    return %arg1, %c0_i32, %c0_i32_0 : i32, i32, i32
  }
  func.func @transform_2(%arg0: i32, %arg1: i32) -> (i32, i32, i32) {
    %c0_i32 = arith.constant 0 : i32
    %c0_i32_0 = arith.constant 0 : i32
    %c0_i32_1 = arith.constant 0 : i32
    return %arg1, %c0_i32, %c0_i32_0 : i32, i32, i32
  }
  func.func @transform_3(%arg0: i32, %arg1: i32) -> (i32, i32, i32) {
    %c0_i32 = arith.constant 0 : i32
    %c0_i32_0 = arith.constant 0 : i32
    %c0_i32_1 = arith.constant 0 : i32
    return %arg1, %c0_i32, %c0_i32_0 : i32, i32, i32
  }
  func.func @transform_4(%arg0: i32, %arg1: i32) -> (i32, i32, i32) {
    %c0_i32 = arith.constant 0 : i32
    %c0_i32_0 = arith.constant 0 : i32
    %c0_i32_1 = arith.constant 0 : i32
    return %arg0, %c0_i32, %c0_i32_0 : i32, i32, i32
  }
}

</mosaic_0001>

<bundles_post_ra>
// kernel: vision_transformer_forward.1
= control target key start
LH: loop header
LB: loop body
LE: loop exit
PB: predicated region body
PF: predicated region fallthrough
CT: control target
= control target key end

     0   :  { %s3578_s0 = inlined_call_operand.hbm [shape: f32[2,8,128], index: 0, kind: input, shape index: {}]   ;;  %s3579_s1 = inlined_call_operand.hbm [shape: bf16[2,128,768], index: 1, kind: input, shape index: {}]   ;;  %s3580_s2 = inlined_call_operand.hbm [shape: bf16[2,256,128], index: 2, kind: input, shape index: {}]   ;;  %s3581_s3 = inlined_call_operand.hbm [shape: f32[2,1,1408], index: 3, kind: input, shape index: {}]   ;;  %s3582_s4 = inlined_call_operand.hbm [shape: f32[2,8,128], index: 4, kind: output, shape index: {}]  }
   0x1   :  { %3584 = sst [smem:[#allocation15_spill]] %s3578_s0 }
   0x2   :  { %3585 = sst [smem:[#allocation16_spill]] %s3579_s1 }
   0x3   :  { %9 = vsyncpa [#allocation3], 0 }
   0x4   :  { %10 = vsyncpa [#allocation6], 0 }
   0x5   :  { %12 = vsyncpa [#allocation6 + $0x1], 0 }
   0x6   :  { %13 = vsyncpa [#allocation9], 0 }
   0x7   :  { %15 = vsyncpa [#allocation9 + $0x1], 0 }
   0x8   :  { %16 = vsyncpa [#allocation4], 0  ;;  %s3083_s15 = smov 0   ;;  %s3085_s16 = smov 0  }
   0x9   :  { %s3087_s17 = smov 0   ;;  %s3089_s18 = smov 0  }
   0xa   :  { %s3091_s19 = smov 0   ;;  %s3093_s20 = smov 0  }
   0xb LB: > { %s31_s21 = sadd.s32 1, %s3033_s19  ;;  %s67_s22 = sadd.s32 1, %s3025_s17  ;;  %s3037_s20 = sphi %s3093_s20, %s22_s20   ;;  %s3033_s19 = sphi %s3091_s19, %s3598_s19   ;;  %s3029_s18 = sphi %s3089_s18, %s3597_s18   ;;  %s3025_s17 = sphi %s3087_s17, %s3596_s17   ;;  %s3021_s16 = sphi %s3085_s16, %s3595_s16   ;;  %s3017_s15 = sphi %s3083_s15, %s3594_s15  }
   0xc   : > { %p32_p0 = scmp.ge.s32.totalorder %s31_s21, 2  ;;  %p74_p1 = scmp.ne.s32.totalorder %s3025_s17, %s3021_s16 }
   0xd   : > { %p75_p2 = scmp.eq.s32.totalorder %s3037_s20, 0  ;;  %p2651_p4 = scmp.lt.s32.totalorder %s3037_s20, 2 }
   0xe   : > { %s3600_s21 = smov (%p32_p0, %s31_s21), 0  ;;  %s198_s24 = sand.u32 1, %s3037_s20  }
   0xf   : > { %p76_p3 = por %p75_p2, %p74_p1  ;;  %s64_s23 = ssub.s32 %s3033_s19, %s3600_s21 }
  0x10   : > { %p65_p5 = scmp.eq.s32.totalorder %s64_s23, 0  ;;  %s3125_s25 = sand.u32 1, %s3025_s17  }
  0x11   : > { %s2617_s26 = smul.u32 6144, %s3033_s19  ;;  %s3586_s1 = sld [smem:[#allocation16_spill]] }
  0x12   : > { %s3129_s27 = scalar_select %p65_p5, %s3025_s17, %s67_s22  }
  0x13   : > { %s2616_s28 = smul.u32 384, %s3125_s25  ;;  %p3135_p6 = pnand %p2651_p4, %p76_p3 }
  0x14   : > { %s3139_s9 = scalar_lea.sflag [#allocation6], %s198_s24  ;;  %s3039_s11 = smov [#allocation5]  }
  0x15   : > { %s202_s7 = scalar_lea.vmem [#allocation5], %s2616_s28  ;;  %p2843_p7 = pneg %p3135_p6 }
  0x16   : > { %s209_s8 = sshll.u32 %s202_s7, 4  ;;  %s2859_s12 = sshll.u32 %s3039_s11, 4  ;;  %s210_s8 = int_to_ptr.vmem [resolvable:$true] %s209_s8  ;;  %s2860_s12 = int_to_ptr.vmem [resolvable:$false] %s2859_s12 }
  0x17   : > { %s208_s5 = scalar_lea.hbm %s3586_s1, %s2617_s26  ;;  %s2854_s10 = scalar_lea.vmem %s210_s8, 6144 }
  0x18   : > { %p2855_p8 = scmp.ne.s32.totalorder %s210_s8, %s2854_s10  ;;  %s2861_s13 = scalar_lea.vmem %s2860_s12, 12288 }
  0x19   : > { %p2862_p11 = scmp.lt.s32.totalorder %s210_s8, %s2860_s12  ;;  %p2863_p12 = scmp.lt.s32.totalorder %s2861_s13, %s2854_s10 }
  0x1a   : > { %p2857_p9 = pnand %p2855_p8, %p2843_p7 }
  0x1b   : > { %p2864_p13 = por %p2863_p12, %p2862_p11 }
  0x1c   : > { %p2858_p10 = pneg %p2857_p9 }
  0x1e   : > { %p2865_p0 = pnand %p2864_p13, %p2858_p10 }
  0x20   : > { %2868 = shalt.err (!%p2865_p0)
}
  0x21   : > { %s3040_s14 = smov 384   ;;  %s3041_s22 = smov 24  }
  0x22   : > { %2643 = dma.hbm_to_vmem [thread:$0]  (!%p3135_p6), %s208_s5, 6144, %s210_s8, %s3139_s9, %s3040_s14, %s3040_s14, %s3041_s22  }
  0x23   : > { %s3150_s23 = sadd.s32 4294967295, %s3037_s20   ;;  %p80_p1 = scmp.ne.s32.totalorder %s3021_s16, %s3017_s15 }
  0x24   : > { %p3583_p2 = scmp.eq.s32.totalorder %s3150_s23, 0  ;;  %p2286_p3 = scmp.ge.s32.totalorder %s3037_s20, 1 }
  0x25   : > { %p169_p4 = scmp.lt.s32.totalorder %s3037_s20, 3  ;;  %s3042_s28 = smov [#allocation2]  }
  0x26   : > { %p3159_p5 = por %p3583_p2, %p80_p1  ;;  %s184_s29 = sshll.u32 %s3042_s28, 4  ;;  %s185_s29 = int_to_ptr.vmem [resolvable:$true] %s184_s29 }
  0x27   : > { %p3163_p8 = pnand %p2286_p3, %p169_p4  ;;  %s2290_s30 = sshll.u32 %s3125_s25, 7 }
  0x28   : > { %s2392_s5 = sshll.u32 %s3033_s19, 11  ;;  %s223_s7 = scalar_lea.vmem [#allocation7], %s2290_s30 }
  0x29   : > { %p2636_p9 = pneg %p3163_p8  ;;  %s230_s8 = sshll.u32 %s223_s7, 4  ;;  %s231_s8 = int_to_ptr.vmem [resolvable:$true] %s230_s8 }
  0x2a   : > { %s3180_s12 = scalar_lea.hbm %s3580_s2, %s2392_s5  ;;  %s2880_s13 = scalar_lea.vmem %s185_s29, 256 }
  0x2b   : > { %p3172_p10 = pnand %p2636_p9, %p3583_p2  ;;  %p2881_p12 = scmp.ne.s32.totalorder %s185_s29, %s2880_s13 }
  0x2c   : > { %p2888_p1 = scmp.lt.s32.totalorder %s185_s29, %s185_s29  ;;  %p2889_p3 = scmp.lt.s32.totalorder %s2880_s13, %s2880_s13 }
  0x2d   : > { %p2871_p11 = pneg %p3172_p10 }
  0x2e   : > { %p2890_p4 = por %p2889_p3, %p2888_p1 }
  0x2f   : > { %p2883_p13 = pnand %p2881_p12, %p2871_p11 }
  0x31   : > { %p2884_p0 = pneg %p2883_p13 }
  0x33   : > { %p2891_p9 = pnand %p2890_p4, %p2884_p0 }
  0x35   : > { %2894 = shalt.err (!%p2891_p9)
}
  0x36   : > { %s3043_s14 = smov 128   ;;  %s3044_s22 = smov 8  }
  0x37   : > { %s3591_s0 = sld [smem:[#allocation15_spill]]  ;;  %s2908_s5 = scalar_lea.vmem %s231_s8, 2048 }
  0x38   : > { %p2909_p2 = scmp.ne.s32.totalorder %s231_s8, %s2908_s5  ;;  %s3045_s7 = smov [#allocation7]  }
  0x39   : > { %s2913_s10 = sshll.u32 %s3045_s7, 4  ;;  %s2914_s10 = int_to_ptr.vmem [resolvable:$false] %s2913_s10 }
  0x3a   : > { %p2911_p11 = pnand %p2909_p2, %p2843_p7  ;;  %s2915_s11 = scalar_lea.vmem %s2914_s10, 4096 }
  0x3b   : > { %p2916_p13 = scmp.lt.s32.totalorder %s231_s8, %s2914_s10  ;;  %p2917_p0 = scmp.lt.s32.totalorder %s2915_s11, %s2908_s5 }
  0x3c   : > { %p2912_p12 = pneg %p2911_p11 }
  0x3d   : > { %2639 = dma.hbm_to_vmem [thread:$0]  (!%p3172_p10), %s3591_s0, 256, %s185_s29, [#allocation3], %s3043_s14, %s3043_s14, %s3044_s22  }
  0x3e   : > { %p2918_p1 = por %p2917_p0, %p2916_p13 }
  0x40   : > { %p2919_p3 = pnand %p2918_p1, %p2912_p12 }
  0x42   : > { %2922 = shalt.err (!%p2919_p3)
}
  0x43   : > { %s3046_s15 = smov 64   ;;  %s3047_s29 = smov 4  }
  0x44   : > { %2646 = dma.hbm_to_vmem [thread:$0]  (!%p3135_p6), %s3180_s12, 2048, %s231_s8, %s3139_s9, %s3046_s15, %s3046_s15, %s3047_s29  }
  0x45   : > { %s2618_s13 = smul.u32 11, %s3125_s25  ;;  %s241_s10 = scalar_lea.sflag [#allocation9], %s3125_s25 }
  0x46   : > { %s2619_s14 = smul.u32 176, %s3033_s19  ;;  %s3048_s0 = smov [#allocation8]  }
  0x47   : > { %s244_s5 = scalar_lea.vmem [#allocation8], %s2618_s13  ;;  %s2941_s1 = sshll.u32 %s3048_s0, 4  ;;  %s2942_s1 = int_to_ptr.vmem [resolvable:$false] %s2941_s1 }
  0x48   : > { %s250_s30 = scalar_lea.hbm %s3581_s3, %s2619_s14  ;;  %s252_s7 = sshll.u32 %s244_s5, 4  ;;  %s253_s7 = int_to_ptr.vmem [resolvable:$true] %s252_s7 }
  0x49   : > { %s2936_s11 = scalar_lea.vmem %s253_s7, 176  ;;  %s2943_s9 = scalar_lea.vmem %s2942_s1, 352 }
  0x4a   : > { %p2937_p2 = scmp.ne.s32.totalorder %s253_s7, %s2936_s11  ;;  %p2944_p9 = scmp.lt.s32.totalorder %s253_s7, %s2942_s1 }
  0x4b   : > { %p2945_p11 = scmp.lt.s32.totalorder %s2943_s9, %s2936_s11 }
  0x4c   : > { %p2939_p10 = pnand %p2937_p2, %p2843_p7 }
  0x4d   : > { %p2946_p12 = por %p2945_p11, %p2944_p9 }
  0x4e   : > { %p2940_p4 = pneg %p2939_p10 }
  0x50   : > { %p2947_p13 = pnand %p2946_p12, %p2940_p4 }
  0x52   : > { %2950 = shalt.err (!%p2947_p13)
}
  0x53   : > { %2649 = dma.hbm_to_vmem [thread:$0]  (!%p3135_p6), %s250_s30, 176, %s253_s7, %s241_s10  }
  0x54   : > { %261 = sbr.rel (%p3163_p8) target bundleno = 4203 (0x106b), region = 36  ;;  %p3592_p0 = scmp.eq.s32.totalorder (!%p3163_p8), %s3150_s23, 0 }
  0x59   : > { %3000 = dma.done.wait (%p3592_p0), [#allocation3], 256   ;;  %p3593_p7 = pmov %p3592_p0 }
  0x5a   : > { %s267_s0 = sand.u32 1, %s3150_s23   ;;  %s269_s1 = sand.u32 1, %s3021_s16  }
  0x5b   : > { %3002 = vsyncadd (%p3593_p7), [#allocation3], 4294967040  ;;  %s2620_s25 = smul.u32 384, %s269_s1  ;;  %s268_s8 = scalar_lea.sflag [#allocation6], %s267_s0 }
  0x5d   : > { %s3215_s12 = scalar_lea.vmem [#allocation5], %s2620_s25 }
  0x5e   : > { %3004 = dma.done.wait (%p3159_p5), %s268_s8, 8192  }
  0x5f   : > { %3006 = vsyncadd (%p3159_p5), %s268_s8, 4294959104  ;;  %s2296_s6 = sshll.u32 %s269_s1, 7  ;;  %s2621_s26 = smul.u32 11, %s269_s1 }
  0x60   : > { %s3221_s15 = scalar_lea.vmem [#allocation7], %s2296_s6  ;;  %s286_s29 = scalar_lea.sflag [#allocation9], %s269_s1 }
  0x61   : > { %s3223_s13 = scalar_lea.vmem [#allocation8], %s2621_s26 }
  0x62   : > { %3008 = dma.done.wait (%p3159_p5), %s286_s29, 176  }
  0x63   : > { %3010 = vsyncadd (%p3159_p5), %s286_s29, 4294967120  ;;  %p2297_p6 = scmp.ne.s32.totalorder %s3029_s18, 0 }
  0x65   : > { %325 = sbr.rel (%p2297_p6) target bundleno = 108 (0x6c), region = 56 }
  0x6a   : > { %v326_v0 = vld [vmem:[#allocation2] sm:$0xff]  ;;  %v327_v1 = vld [vmem:[#allocation2 + $0x8] sm:$0xff] }
  0x6b   : > { %328 = vst [vmem:[#allocation10] sm:$0xff] %v326_v0  ;;  %329 = vst [vmem:[#allocation10 + $0x8] sm:$0xff] %v327_v1 }
  0x6c PF: > { %v2719_v4 = vld [vmem:[%s3215_s12 + $0x154] ss:$24 sps:$4 sm:$0xff]   ;;  %v2721_v5 = vld [vmem:[%s3215_s12 + $0x150] ss:$24 sps:$4 sm:$0xff]   ;;  %v3049_v6 = vmov 0.0   ;;  %v3050_v29 = vmov 0   ;;  %v461_v55 = vlaneseq }
  0x6d   : > { %2468 = vmatprep.subr.bf16.mxu1 %v3049_v6  ;;  %v2722_v7 = vld [vmem:[%s3215_s12 + $0x158] ss:$24 sps:$4 sm:$0xff]   ;;  %604 = vmatprep.subr.bf16.mxu0 %v2719_v4  ;;  %v2723_v16 = vld [vmem:[%s3215_s12 + $0x124] ss:$24 sps:$4 sm:$0xff]   ;;  %v2726_v18 = vld [vmem:[%s3215_s12 + $0x128] ss:$24 sps:$4 sm:$0xff]  }
  0x6e   : > { %605 = vmatpush1.bf16.msra.mxu0 %v2721_v5  ;;  %2469 = vmatpush3.bf16.msra.mxu1 %v2722_v7  ;;  %v2725_v17 = vld [vmem:[%s3215_s12 + $0x120] ss:$24 sps:$4 sm:$0xff]   ;;  %v2727_v19 = vld [vmem:[%s3215_s12 + $0xf4] ss:$24 sps:$4 sm:$0xff]   ;;  %v2729_v20 = vld [vmem:[%s3215_s12 + $0xf0] ss:$24 sps:$4 sm:$0xff]  }
  0x6f   : > { %2470 = vmatprep.subr.bf16.mxu1 %v3049_v6  ;;  %606 = vmatprep.subr.bf16.mxu0 %v2723_v16  ;;  %v2730_v21 = vld [vmem:[%s3215_s12 + $0xf8] ss:$24 sps:$4 sm:$0xff]   ;;  %v2731_v22 = vld [vmem:[%s3215_s12 + $0xc4] ss:$24 sps:$4 sm:$0xff]   ;;  %v2734_v24 = vld [vmem:[%s3215_s12 + $0xc8] ss:$24 sps:$4 sm:$0xff]  }
  0x70   : > { %v2733_v23 = vld [vmem:[%s3215_s12 + $0xc0] ss:$24 sps:$4 sm:$0xff]   ;;  %v2735_v25 = vld [vmem:[%s3215_s12 + $0x94] ss:$24 sps:$4 sm:$0xff]   ;;  %v2737_v26 = vld [vmem:[%s3215_s12 + $0x90] ss:$24 sps:$4 sm:$0xff]   ;;  %636 = vmatprep.mubr.bf16.mxu0 %v3050_v29 }
  0x71   : > { %v2738_v27 = vld [vmem:[%s3215_s12 + $0x98] ss:$24 sps:$4 sm:$0xff]   ;;  %v2739_v28 = vld [vmem:[%s3215_s12 + $0x64] ss:$24 sps:$4 sm:$0xff]   ;;  %vm3051_vm0 = vmmov 0   ;;  %v3283_v56 = vshrl.u32 %v461_v55, 7 }
  0x72   : > { %v330_v2 = vld [vmem:[#allocation10] sm:$0xff]  ;;  %v331_v3 = vld [vmem:[#allocation10 + $0x8] sm:$0xff]  ;;  %607 = vmatpush1.bf16.msra.mxu0 %v2725_v17  ;;  %2471 = vmatpush3.bf16.msra.mxu1 %v2726_v18  ;;  %v2745_v33 = vld [vmem:[%s3215_s12 + $0x30] ss:$24 sps:$4 sm:$0xff]   ;;  %vm694_vm1 = vcmask 261120   ;;  %vm815_vm2 = vcmask 1043456  }
  0x73   : > { %420 = vadd.xlane.f32.xlu0 %v330_v2  ;;  %2472 = vmatprep.subr.bf16.mxu1 %v3049_v6  ;;  %v2741_v30 = vld [vmem:[%s3215_s12 + $0x60] ss:$24 sps:$4 sm:$0xff]   ;;  %v2743_v32 = vld [vmem:[%s3215_s12 + $0x34] ss:$24 sps:$4 sm:$0xff]   ;;  %v2747_v35 = vld [vmem:[%s3215_s12 + $0x4] ss:$24 sps:$4 sm:$0xff]  }
  0x74   : > { %608 = vmatprep.subr.bf16.mxu0 %v2727_v19  ;;  %2484 = vmatprep.mubr.msk.bf16.mxu1 %vm3051_vm0, %v3049_v6  ;;  %v2742_v31 = vld [vmem:[%s3215_s12 + $0x68] ss:$24 sps:$4 sm:$0xff]   ;;  %v2746_v34 = vld [vmem:[%s3215_s12 + $0x38] ss:$24 sps:$4 sm:$0xff]   ;;  %v2298_v46 = vld [vmem:[%s3223_s13 + $0x4] ss:$0 sm:$0xff] }
  0x75   : > { %v2749_v36 = vld [vmem:[%s3215_s12] ss:$24 sps:$4 sm:$0xff]   ;;  %v2299_v50 = vld [vmem:[%s3223_s13 + $0x5] ss:$0 sm:$0xff]  ;;  %v467_v57 = vsub.s32 1, %v3283_v56  ;;  %v471_v59 = vsub.s32 2, %v3283_v56 }
  0x76   : > { %609 = vmatpush1.bf16.msra.mxu0 %v2729_v20  ;;  %2473 = vmatpush3.bf16.msra.mxu1 %v2730_v21  ;;  %v2750_v37 = vld [vmem:[%s3215_s12 + $0x8] ss:$24 sps:$4 sm:$0xff]   ;;  %v463_v63 = vsub.s32 0, %v3283_v56  ;;  %vm787_vm3 = vcmask 64512   ;;  %s3052_s18 = smov 96   ;;  %s3053_s24 = smov 64  }
  0x77   : > { %422 = vadd.xlane.f32.xlu0 %v331_v3  ;;  %2474 = vmatprep.subr.bf16.mxu1 %v3049_v6  ;;  %v412_v58 = vld [vmem:[%s3223_s13] sm:$0x7]  ;;  %s3054_s14 = smov 32   ;;  %v2371_v56 = vld [vmem:[%s3223_s13 + $0xa] ss:$0 sm:$0xff]  ;;  %s3055_s22 = smov [#allocation10]  }
  0x78   : > { %610 = vmatprep.subr.bf16.mxu0 %v2731_v22  ;;  %v468_v60 = vrot.slane %v412_v58, %v467_v57  ;;  %v464_v7 = vrot.slane %v412_v58, %v463_v63  ;;  %s2164_s28 = sshll.u32 %s3055_s22, 4  ;;  %p2653_p5 = scmp.eq.s32.totalorder %s3150_s23, 1  ;;  %s2165_s28 = int_to_ptr.vmem [resolvable:$true] %s2164_s28 }
  0x79   : > { %s2951_s30 = scalar_lea.vmem %s2165_s28, 256  ;;  %p2958_p2 = scmp.lt.s32.totalorder %s2165_s28, %s2165_s28 }
  0x7a   : > { %611 = vmatpush1.bf16.msra.mxu0 %v2733_v23  ;;  %2475 = vmatpush3.bf16.msra.mxu1 %v2734_v24  ;;  %p2952_p8 = scmp.ne.s32.totalorder %s2165_s28, %s2951_s30  ;;  %p2959_p10 = scmp.lt.s32.totalorder %s2951_s30, %s2951_s30 }
  0x7b   : > { %612 = vmatprep.subr.bf16.mxu0 %v2735_v25  ;;  %2476 = vmatprep.subr.bf16.mxu1 %v3049_v6 }
  0x7c   : > { %p2953_p1 = pnand %p2952_p8, %p2653_p5  ;;  %p2960_p4 = por %p2959_p10, %p2958_p2 }
  0x7e   : > { %613 = vmatpush1.bf16.msra.mxu0 %v2737_v26  ;;  %2477 = vmatpush3.bf16.msra.mxu1 %v2738_v27  ;;  %p2954_p3 = pneg %p2953_p1 }
  0x7f   : > { %614 = vmatprep.subr.bf16.mxu0 %v2739_v28  ;;  %2478 = vmatprep.subr.bf16.mxu1 %v3049_v6 }
  0x80   : > { %p2961_p9 = pnand %p2960_p4, %p2954_p3 }
  0x82   : > { %615 = vmatpush1.bf16.msra.mxu0 %v2741_v30  ;;  %2479 = vmatpush3.bf16.msra.mxu1 %v2742_v31 }
  0x83   : > { %616 = vmatprep.subr.bf16.mxu0 %v2743_v32  ;;  %2480 = vmatprep.subr.bf16.mxu1 %v3049_v6 }
  0x86   : > { %617 = vmatpush1.bf16.msra.mxu0 %v2745_v33  ;;  %2481 = vmatpush3.bf16.msra.mxu1 %v2746_v34 }
  0x87   : > { %618 = vmatprep.subr.bf16.mxu0 %v2747_v35  ;;  %2482 = vmatprep.subr.bf16.mxu1 %v3049_v6 }
  0x8a   : > { %619 = vmatpush1.bf16.msra.mxu0 %v2749_v36  ;;  %2483 = vmatpush3.bf16.msra.mxu1 %v2750_v37 }
  0x8b   : > { %2488 = vmatprep.subr.bf16.mxu0 %v3049_v6  ;;  %2494 = vmatprep.subr.bf16.mxu1 %v3049_v6 }
  0xfc   : > { %v421_v8 = vpop.xlane.xlu0 %420 }
  0xfd   : > { %v425_v9 = vmul.f32 0.0078125, %v421_v8 }
  0xff   : > { %v3235_v10 = vsub.f32 %v330_v2, %v425_v9  ;;  %v472_v2 = vrot.slane %v412_v58, %v471_v59 }
 0x100   : > { %v423_v11 = vpop.xlane.xlu0 %422 }
 0x101   : > { %v426_v12 = vmul.f32 0.0078125, %v423_v11  ;;  %v429_v13 = vmul.f32 %v3235_v10, %v3235_v10 }
 0x103   : > { %v3239_v14 = vsub.f32 %v331_v3, %v426_v12  ;;  %431 = vadd.xlane.f32.xlu1 %v429_v13 }
 0x105   : > { %v430_v15 = vmul.f32 %v3239_v14, %v3239_v14 }
 0x107   : > { %433 = vadd.xlane.f32.xlu1 %v430_v15 }
 0x18c   : > { %v432_v38 = vpop.xlane.xlu1 %431 }
 0x18d   : > { %v435_v39 = vmul.f32 0.0078125, %v432_v38 }
 0x18f   : > { %v437_v40 = vadd.f32 1e-05, %v435_v39 }
 0x190   : > { %v434_v41 = vpop.xlane.xlu1 %433 }
 0x191   : > { %2799 = vrsqrt.f32 %v437_v40  ;;  %v436_v42 = vmul.f32 0.0078125, %v434_v41 }
 0x193   : > { %v438_v43 = vadd.f32 1e-05, %v436_v42 }
 0x195   : > { %2801 = vrsqrt.f32 %v438_v43 }
 0x19e   : > { %v2800_v44 = vpop.eup %2799 }
 0x19f   : > { %v441_v45 = vmul.f32 %v2800_v44, %v3235_v10 }
 0x1a1   : > { %v449_v49 = vmul.f32 %v2298_v46, %v441_v45 }
 0x1a2   : > { %v2802_v47 = vpop.eup %2801 }
 0x1a3   : > { %v442_v48 = vmul.f32 %v2802_v47, %v3239_v14  ;;  %v457_v52 = vadd.f32 %v2299_v50, %v449_v49 }
 0x1a5   : > { %v450_v51 = vmul.f32 %v2298_v46, %v442_v48 }
 0x1a7   : > { %v458_v53 = vadd.f32 %v2299_v50, %v450_v51 }
 0x1a9   : > { %v459_v54 = vpack.c.bf16 %v458_v53, %v457_v52 }
 0x1ab   : > { %637 = vmatmul.mubr.bf16.vlgmr.msra.gmra.mxu0 %v459_v54  ;;  %2485 = vmatmul.mubr.bf16.vlgmr.msra.gmra.mxu1 %v459_v54 }
 0x1ac   : > { %2490 = vmatprep.mubr.msk.bf16.mxu0 %vm3051_vm0, %v3049_v6  ;;  %2496 = vmatprep.mubr.msk.bf16.mxu1 %vm3051_vm0, %v3049_v6 }
 0x26b   : > { %v638_v61 = vpop.f32.mrf.mxu0  ;;  %v681_v62 = vpop.f32.mrf.mxu1 }
 0x26c   : > { %v682_v11 = vadd.f32 %v681_v62, %v472_v2  ;;  %v639_v14 = vadd.f32 %v638_v61, %v464_v7 }
 0x26d   : > { %v640_v0 = vpop.f32.mrf.mxu0  ;;  %v2486_v1 = vpop.f32.mrf.mxu1 }
 0x26e   : > { %v641_v3 = vadd.f32 %v640_v0, %v468_v60  ;;  %v3300_v16 = vpack.c.bf16 %v682_v11, %v682_v11  ;;  %v3304_v19 = vpack.c.bf16 %v639_v14, %v639_v14 }
 0x26f   : > { %v642_v4 = vpop.f32.mrf.mxu0  ;;  %v684_v5 = vpop.f32.mrf.mxu1 }
 0x270   : > { %v3293_v8 = vpack.c.bf16 %v641_v3, %v641_v3  ;;  %v685_v17 = vadd.f32 %v684_v5, %v472_v2  ;;  %v643_v20 = vadd.f32 %v642_v4, %v464_v7  ;;  %v817_v22 = vsel %vm815_vm2, %v3300_v16, 0 }
 0x271   : > { %v644_v9 = vpop.f32.mrf.mxu0  ;;  %v2487_v10 = vpop.f32.mrf.mxu1 }
 0x272   : > { %v645_v12 = vadd.f32 %v644_v9, %v468_v60  ;;  %v699_v13 = vsel %vm694_vm1, %v3293_v8, 0  ;;  %v3307_v21 = vpack.c.bf16 %v685_v17, %v685_v17  ;;  %v3315_v23 = vpack.c.bf16 %v643_v20, %v643_v20 }
 0x273   : > { %2489 = vmatpush3.bf16.xpose.msra.mxu0 %v699_v13 }
 0x274   : > { %v3297_v15 = vpack.c.bf16 %v645_v12, %v645_v12  ;;  %2500 = vmatprep.subr.bf16.mxu0 %v3049_v6  ;;  %v863_v24 = vsel %vm815_vm2, %v3307_v21, 0 }
 0x276   : > { %v745_v18 = vsel %vm694_vm1, %v3297_v15, 0 }
 0x277   : > { %2495 = vmatpush3.bf16.xpose.msra.mxu1 %v745_v18 }
 0x278   : > { %2506 = vmatprep.subr.bf16.mxu1 %v3049_v6 }
 0x27a   : > { %2491 = vmatmul.mubr.msk.bf16.vlgmr.msra.gmra.mxu0 %vm694_vm1, %v3304_v19 }
 0x27b   : > { %2501 = vmatpush3.bf16.msra.mxu0 %v817_v22  ;;  %2502 = vmatprep.mubr.msk.bf16.mxu0 %vm3051_vm0, %v3049_v6 }
 0x27c   : > { %2512 = vmatprep.subr.bf16.mxu0 %v3049_v6 }
 0x27e   : > { %2497 = vmatmul.mubr.msk.bf16.vlgmr.msra.gmra.mxu1 %vm694_vm1, %v3315_v23 }
 0x27f   : > { %2507 = vmatpush3.bf16.msra.mxu1 %v863_v24  ;;  %2508 = vmatprep.mubr.msk.bf16.mxu1 %vm3051_vm0, %v3049_v6 }
 0x280   : > { %2518 = vmatprep.subr.bf16.mxu1 %v3049_v6 }
 0x33a   : > { %v735_v25 = vpop.f32.mrf.mxu0 }
 0x33b   : > { %v788_v26 = vsel %vm787_vm3, %v735_v25, -inf }
 0x33c   : > { %789 = vmax.xlane.f32.xlu0 %v788_v26  ;;  %v2492_v27 = vpop.f32.mrf.mxu0 }
 0x33e   : > { %v738_v28 = vpop.f32.mrf.mxu0  ;;  %v781_v30 = vpop.f32.mrf.mxu1 }
 0x33f   : > { %v791_v31 = vsel %vm787_vm3, %v781_v30, -inf }
 0x340   : > { %792 = vmax.xlane.f32.xlu1 %v791_v31  ;;  %v2493_v32 = vpop.f32.mrf.mxu0  ;;  %v2498_v33 = vpop.f32.mrf.mxu1 }
 0x342   : > { %v784_v34 = vpop.f32.mrf.mxu1 }
 0x344   : > { %v2499_v35 = vpop.f32.mrf.mxu1 }
 0x351   : > { %966 = vrot.lane.b32.xlu1 %v3297_v15, %s3052_s18 }
 0x3c5   : > { %v790_v36 = vpop.xlane.xlu0 %789 }
 0x3c6   : > { %v794_v37 = vsub.f32 %v735_v25, %v790_v36 }
 0x3c8   : > { %v796_v38 = vmul.f32 1.442695, %v794_v37 }
 0x3c9   : > { %v793_v39 = vpop.xlane.xlu1 %792 }
 0x3ca   : > { %2803 = vpow2.f32 %v796_v38  ;;  %v795_v40 = vsub.f32 %v781_v30, %v793_v39 }
 0x3cc   : > { %v798_v41 = vmul.f32 1.442695, %v795_v40 }
 0x3cd   : > { %v967_v46 = vpop.permute.xlu1 %966 }
 0x3ce   : > { %2805 = vpow2.f32 %v798_v41  ;;  %v972_v59 = vsel %vm694_vm1, %v967_v46, 0 }
 0x3d7   : > { %v2804_v42 = vpop.eup %2803 }
 0x3d8   : > { %v800_v43 = vsel %vm787_vm3, %v2804_v42, 0.0 }
 0x3d9   : > { %801 = vadd.xlane.f32.xlu0 %v800_v43 }
 0x3db   : > { %v2806_v44 = vpop.eup %2805 }
 0x3dc   : > { %v803_v45 = vsel %vm787_vm3, %v2806_v44, 0.0 }
 0x3dd   : > { %804 = vadd.xlane.f32.xlu1 %v803_v45 }
 0x3ee   : > { %911 = vrot.lane.b32.xlu1 %v3304_v19, %s3052_s18 }
 0x3ef   : > { %914 = vrot.lane.b32.xlu0 %v3293_v8, %s3052_s18 }
 0x3f2   : > { %963 = vrot.lane.b32.xlu1 %v3315_v23, %s3052_s18 }
 0x462   : > { %v802_v47 = vpop.xlane.xlu0 %801 }
 0x463   : > { %2807 = vrcp.f32 %v802_v47 }
 0x466   : > { %v805_v48 = vpop.xlane.xlu1 %804  ;;  %v915_v51 = vpop.permute.xlu0 %914 }
 0x467   : > { %2809 = vrcp.f32 %v805_v48  ;;  %v920_v54 = vsel %vm694_vm1, %v915_v51, 0  ;;  %v2751_v48 = vld [vmem:[%s3215_s12 + $0x3c] ss:$24 sps:$4 sm:$0xff]   ;;  %v2752_v51 = vld [vmem:[%s3215_s12 + $0xc] ss:$24 sps:$4 sm:$0xff]  }
 0x46a   : > { %v912_v60 = vpop.permute.xlu1 %911 }
 0x46e   : > { %v964_v61 = vpop.permute.xlu1 %963 }
 0x470   : > { %v2808_v49 = vpop.eup %2807 }
 0x471   : > { %v808_v50 = vmul.f32 %v2808_v49, %v2804_v42 }
 0x473   : > { %v810_v52 = vpack.c.bf16 %v808_v50, %v808_v50 }
 0x474   : > { %v2810_v53 = vpop.eup %2809 }
 0x475   : > { %2503 = vmatmul.mubr.msk.bf16.vlgmr.msra.gmra.mxu0 %vm787_vm3, %v810_v52  ;;  %v809_v55 = vmul.f32 %v2810_v53, %v2806_v44  ;;  %v2753_v44 = vld [vmem:[%s3215_s12 + $0x9c] ss:$24 sps:$4 sm:$0xff]  }
 0x476   : > { %2513 = vmatpush3.bf16.xpose.msra.mxu0 %v920_v54  ;;  %2514 = vmatprep.mubr.msk.bf16.mxu0 %vm3051_vm0, %v3049_v6 }
 0x477   : > { %v811_v58 = vpack.c.bf16 %v809_v55, %v809_v55  ;;  %2524 = vmatprep.subr.bf16.mxu0 %v3049_v6  ;;  %v2754_v55 = vld [vmem:[%s3215_s12 + $0x6c] ss:$24 sps:$4 sm:$0xff]  }
 0x479   : > { %2509 = vmatmul.mubr.msk.bf16.vlgmr.msra.gmra.mxu1 %vm787_vm3, %v811_v58 }
 0x47a   : > { %2519 = vmatpush3.bf16.xpose.msra.mxu1 %v972_v59  ;;  %2520 = vmatprep.mubr.msk.bf16.mxu1 %vm3051_vm0, %v3049_v6 }
 0x47b   : > { %2530 = vmatprep.subr.bf16.mxu1 %v3049_v6 }
 0x47d   : > { %2515 = vmatmul.mubr.msk.bf16.vlgmr.msra.gmra.mxu0 %vm694_vm1, %v912_v60 }
 0x47e   : > { %2526 = vmatprep.mubr.msk.bf16.mxu0 %vm3051_vm0, %v3049_v6 }
 0x481   : > { %2521 = vmatmul.mubr.msk.bf16.vlgmr.msra.gmra.mxu1 %vm694_vm1, %v964_v61 }
 0x482   : > { %2532 = vmatprep.mubr.msk.bf16.mxu1 %vm3051_vm0, %v3049_v6 }
 0x535   : > { %v3353_v62 = vpop.f32.mrf.mxu0 }
 0x537   : > { %v2504_v0 = vpop.f32.mrf.mxu0 }
 0x539   : > { %v856_v1 = vpop.f32.mrf.mxu0  ;;  %v3355_v2 = vpop.f32.mrf.mxu1 }
 0x53a   : > { %v909_v3 = vpack.c.bf16 %v3355_v2, %v3353_v62 }
 0x53b   : > { %v2505_v4 = vpop.f32.mrf.mxu0  ;;  %v2510_v5 = vpop.f32.mrf.mxu1 }
 0x53d   : > { %v902_v7 = vpop.f32.mrf.mxu1  ;;  %v956_v9 = vpop.f32.mrf.mxu0 }
 0x53e   : > { %v1014_v10 = vsel %vm787_vm3, %v956_v9, -inf }
 0x53f   : > { %v2511_v11 = vpop.f32.mrf.mxu1  ;;  %1015 = vmax.xlane.f32.xlu0 %v1014_v10  ;;  %v2516_v12 = vpop.f32.mrf.mxu0 }
 0x541   : > { %v959_v13 = vpop.f32.mrf.mxu0  ;;  %v1008_v14 = vpop.f32.mrf.mxu1 }
 0x542   : > { %v1017_v17 = vsel %vm787_vm3, %v1008_v14, -inf }
 0x543   : > { %1018 = vmax.xlane.f32.xlu1 %v1017_v17  ;;  %v2517_v18 = vpop.f32.mrf.mxu0  ;;  %v2522_v20 = vpop.f32.mrf.mxu1 }
 0x545   : > { %v1011_v22 = vpop.f32.mrf.mxu1 }
 0x547   : > { %v2523_v24 = vpop.f32.mrf.mxu1 }
 0x554   : > { %1088 = vrot.lane.b32.xlu1 %v3307_v21, %s3052_s18 }
 0x558   : > { %1255 = vrot.lane.b32.xlu1 %v3293_v8, %s3053_s24 }
 0x55c   : > { %1305 = vrot.lane.b32.xlu1 %v3297_v15, %s3053_s24 }
 0x560   : > { %1303 = vrot.lane.b32.xlu1 %v3315_v23, %s3053_s24 }
 0x5c8   : > { %v1016_v25 = vpop.xlane.xlu0 %1015 }
 0x5c9   : > { %v1020_v26 = vsub.f32 %v956_v9, %v1016_v25 }
 0x5cb   : > { %v1022_v27 = vmul.f32 1.442695, %v1020_v26 }
 0x5cc   : > { %v1019_v28 = vpop.xlane.xlu1 %1018 }
 0x5cd   : > { %2811 = vpow2.f32 %v1022_v27  ;;  %v1021_v30 = vsub.f32 %v1008_v14, %v1019_v28 }
 0x5cf   : > { %v1024_v31 = vmul.f32 1.442695, %v1021_v30 }
 0x5d0   : > { %v1089_v32 = vpop.permute.xlu1 %1088 }
 0x5d1   : > { %2813 = vpow2.f32 %v1024_v31  ;;  %v1094_v33 = vsel %vm815_vm2, %v1089_v32, 0 }
 0x5d2   : > { %2531 = vmatpush3.bf16.msra.mxu1 %v1094_v33 }
 0x5d3   : > { %2544 = vmatprep.subr.bf16.mxu1 %v3049_v6 }
 0x5d4   : > { %v1256_v50 = vpop.permute.xlu1 %1255 }
 0x5d5   : > { %v1261_v2 = vsel %vm694_vm1, %v1256_v50, 0 }
 0x5d8   : > { %v1306_v52 = vpop.permute.xlu1 %1305 }
 0x5d9   : > { %v1311_v53 = vsel %vm694_vm1, %v1306_v52, 0 }
 0x5da   : > { %v2812_v34 = vpop.eup %2811 }
 0x5db   : > { %v1026_v35 = vsel %vm787_vm3, %v2812_v34, 0.0 }
 0x5dc   : > { %1027 = vadd.xlane.f32.xlu0 %v1026_v35  ;;  %v1304_v54 = vpop.permute.xlu1 %1303 }
 0x5de   : > { %v2814_v36 = vpop.eup %2813 }
 0x5df   : > { %v1029_v37 = vsel %vm787_vm3, %v2814_v36, 0.0 }
 0x5e0   : > { %1030 = vadd.xlane.f32.xlu0 %v1029_v37 }
 0x5f6   : > { %1039 = vrot.lane.b32.xlu0 %v3300_v16, %s3052_s18 }
 0x5fa   : > { %1253 = vrot.lane.b32.xlu0 %v3304_v19, %s3053_s24 }
 0x665   : > { %v1028_v38 = vpop.xlane.xlu0 %1027 }
 0x666   : > { %2815 = vrcp.f32 %v1028_v38 }
 0x669   : > { %v1031_v39 = vpop.xlane.xlu0 %1030 }
 0x66a   : > { %2817 = vrcp.f32 %v1031_v39 }
 0x66d   : > { %v1040_v40 = vpop.permute.xlu0 %1039 }
 0x66e   : > { %v1045_v41 = vsel %vm815_vm2, %v1040_v40, 0 }
 0x66f   : > { %2525 = vmatpush3.bf16.msra.mxu0 %v1045_v41 }
 0x670   : > { %2536 = vmatprep.subr.bf16.mxu0 %v3049_v6 }
 0x671   : > { %v1254_v7 = vpop.permute.xlu0 %1253 }
 0x673   : > { %v2816_v42 = vpop.eup %2815 }
 0x674   : > { %v1034_v43 = vmul.f32 %v2816_v42, %v2812_v34 }
 0x676   : > { %v1036_v45 = vpack.c.bf16 %v1034_v43, %v1034_v43 }
 0x677   : > { %v2818_v46 = vpop.eup %2817 }
 0x678   : > { %2527 = vmatmul.mubr.msk.bf16.vlgmr.msra.gmra.mxu0 %vm787_vm3, %v1036_v45  ;;  %v1035_v47 = vmul.f32 %v2818_v46, %v2814_v36 }
 0x679   : > { %2537 = vmatpush3.bf16.msra.mxu0 %v2753_v44  ;;  %2540 = vmatprep.mubr.msk.bf16.mxu0 %vm3051_vm0, %v3049_v6 }
 0x67a   : > { %v1037_v49 = vpack.c.bf16 %v1035_v47, %v1035_v47  ;;  %2538 = vmatprep.subr.bf16.mxu0 %v3049_v6 }
 0x67c   : > { %2533 = vmatmul.mubr.msk.bf16.vlgmr.msra.gmra.mxu1 %vm787_vm3, %v1037_v49 }
 0x67d   : > { %2545 = vmatpush3.bf16.msra.mxu1 %v2751_v48  ;;  %2548 = vmatprep.mubr.msk.bf16.mxu1 %vm3051_vm0, %v3049_v6 }
 0x67e   : > { %2546 = vmatprep.subr.bf16.mxu1 %v3049_v6  ;;  %2539 = vmatpush3.bf16.msra.mxu0 %v2754_v55 }
 0x67f   : > { %2552 = vmatprep.subr.bf16.mxu0 %v3049_v6 }
 0x681   : > { %2547 = vmatpush3.bf16.msra.mxu1 %v2752_v51 }
 0x682   : > { %2558 = vmatprep.subr.bf16.mxu1 %v3049_v6 }
 0x684   : > { %2549 = vmatmul.mubr.msk.bf16.vlgmr.msra.gmra.mxu1 %vm694_vm1, %v909_v3 }
 0x685   : > { %2559 = vmatpush3.bf16.xpose.msra.mxu1 %v1311_v53  ;;  %2560 = vmatprep.mubr.msk.bf16.mxu1 %vm3051_vm0, %v3049_v6 }
 0x686   : > { %2570 = vmatprep.subr.bf16.mxu1 %v3049_v6 }
 0x68c   : > { %2561 = vmatmul.mubr.msk.bf16.vlgmr.msra.gmra.mxu1 %vm694_vm1, %v1304_v54 }
 0x68d   : > { %2572 = vmatprep.mubr.msk.bf16.mxu1 %vm3051_vm0, %v3049_v6 }
 0x738   : > { %v1081_v58 = vpop.f32.mrf.mxu0 }
 0x73a   : > { %v2528_v59 = vpop.f32.mrf.mxu0 }
 0x73b   : > { %v2755_v59 = vld [vmem:[%s3215_s12 + $0xfc] ss:$24 sps:$4 sm:$0xff]  }
 0x73c   : > { %v1084_v60 = vpop.f32.mrf.mxu0  ;;  %v1130_v61 = vpop.f32.mrf.mxu1 }
 0x73d   : > { %v1140_v62 = vpack.c.bf16 %v1130_v61, %v1081_v58  ;;  %v2756_v60 = vld [vmem:[%s3215_s12 + $0xcc] ss:$24 sps:$4 sm:$0xff]  }
 0x73e   : > { %v2529_v0 = vpop.f32.mrf.mxu0  ;;  %v2534_v1 = vpop.f32.mrf.mxu1 }
 0x73f   : > { %2541 = vmatmul.mubr.msk.bf16.vlgmr.msra.gmra.mxu0 %vm694_vm1, %v1140_v62 }
 0x740   : > { %2553 = vmatpush3.bf16.xpose.msra.mxu0 %v1261_v2  ;;  %v1133_v3 = vpop.f32.mrf.mxu1  ;;  %2554 = vmatprep.mubr.msk.bf16.mxu0 %vm3051_vm0, %v3049_v6 }
 0x741   : > { %2564 = vmatprep.subr.bf16.mxu0 %v3049_v6 }
 0x742   : > { %v2535_v4 = vpop.f32.mrf.mxu1 }
 0x744   : > { %v3409_v5 = vpop.f32.mrf.mxu1 }
 0x746   : > { %v2550_v9 = vpop.f32.mrf.mxu1 }
 0x747   : > { %2555 = vmatmul.mubr.msk.bf16.vlgmr.msra.gmra.mxu0 %vm694_vm1, %v1254_v7 }
 0x748   : > { %v3412_v10 = vpop.f32.mrf.mxu1  ;;  %2566 = vmatprep.mubr.msk.bf16.mxu0 %vm3051_vm0, %v3049_v6 }
 0x74a   : > { %v2551_v11 = vpop.f32.mrf.mxu1 }
 0x74c   : > { %v1347_v12 = vpop.f32.mrf.mxu1 }
 0x74d   : > { %v1356_v13 = vsel %vm787_vm3, %v1347_v12, -inf }
 0x74e   : > { %1357 = vmax.xlane.f32.xlu1 %v1356_v13  ;;  %v2562_v14 = vpop.f32.mrf.mxu1 }
 0x750   : > { %v1350_v17 = vpop.f32.mrf.mxu1 }
 0x752   : > { %v2563_v18 = vpop.f32.mrf.mxu1 }
 0x75f   : > { %1425 = vrot.lane.b32.xlu1 %v3307_v21, %s3053_s24 }
 0x763   : > { %1538 = vrot.lane.b32.xlu1 %v3293_v8, %s3054_s14 }
 0x767   : > { %1588 = vrot.lane.b32.xlu1 %v3297_v15, %s3054_s14 }
 0x76b   : > { %1586 = vrot.lane.b32.xlu1 %v3315_v23, %s3054_s14 }
 0x7d7   : > { %v1358_v20 = vpop.xlane.xlu1 %1357 }
 0x7d8   : > { %v1360_v25 = vsub.f32 %v1347_v12, %v1358_v20 }
 0x7da   : > { %v1363_v26 = vmul.f32 1.442695, %v1360_v25 }
 0x7db   : > { %v1426_v22 = vpop.permute.xlu1 %1425 }
 0x7dc   : > { %v1431_v24 = vsel %vm815_vm2, %v1426_v22, 0  ;;  %2819 = vpow2.f32 %v1363_v26 }
 0x7dd   : > { %2571 = vmatpush3.bf16.msra.mxu1 %v1431_v24 }
 0x7de   : > { %2584 = vmatprep.subr.bf16.mxu1 %v3049_v6 }
 0x7df   : > { %v1539_v44 = vpop.permute.xlu1 %1538 }
 0x7e0   : > { %v1544_v46 = vsel %vm694_vm1, %v1539_v44, 0 }
 0x7e3   : > { %v1589_v3 = vpop.permute.xlu1 %1588 }
 0x7e4   : > { %v1594_v11 = vsel %vm694_vm1, %v1589_v3, 0 }
 0x7e7   : > { %v1587_v14 = vpop.permute.xlu1 %1586 }
 0x7e9   : > { %v2820_v23 = vpop.eup %2819 }
 0x7ea   : > { %v1368_v34 = vsel %vm787_vm3, %v2820_v23, 0.0 }
 0x7ff   : > { %v3427_v27 = vpop.f32.mrf.mxu0 }
 0x800   : > { %v1247_v25 = vadd.f32 %v3409_v5, %v3427_v27 }
 0x801   : > { %v2542_v28 = vpop.f32.mrf.mxu0 }
 0x803   : > { %v3429_v8 = vpop.f32.mrf.mxu0 }
 0x805   : > { %v2543_v30 = vpop.f32.mrf.mxu0 }
 0x807   : > { %v1297_v15 = vpop.f32.mrf.mxu0 }
 0x808   : > { %v1353_v31 = vsel %vm787_vm3, %v1297_v15, -inf }
 0x809   : > { %1354 = vmax.xlane.f32.xlu0 %v1353_v31  ;;  %v2556_v32 = vpop.f32.mrf.mxu0 }
 0x80b   : > { %v1300_v33 = vpop.f32.mrf.mxu0 }
 0x80d   : > { %1369 = vadd.xlane.f32.xlu0 %v1368_v34  ;;  %v2557_v35 = vpop.f32.mrf.mxu0 }
 0x892   : > { %v1355_v36 = vpop.xlane.xlu0 %1354 }
 0x893   : > { %v1359_v37 = vsub.f32 %v1297_v15, %v1355_v36  ;;  %v1250_v15 = vadd.f32 %v3412_v10, %v3429_v8 }
 0x895   : > { %v1361_v38 = vmul.f32 1.442695, %v1359_v37 }
 0x896   : > { %v1370_v39 = vpop.xlane.xlu0 %1369 }
 0x897   : > { %2821 = vpow2.f32 %v1361_v38 }
 0x898   : > { %2823 = vrcp.f32 %v1370_v39 }
 0x8a4   : > { %v2822_v40 = vpop.eup %2821 }
 0x8a5   : > { %v2824_v41 = vpop.eup %2823  ;;  %v1365_v42 = vsel %vm787_vm3, %v2822_v40, 0.0 }
 0x8a6   : > { %1366 = vadd.xlane.f32.xlu0 %v1365_v42  ;;  %v1374_v43 = vmul.f32 %v2824_v41, %v2820_v23 }
 0x8a8   : > { %v1376_v45 = vpack.c.bf16 %v1374_v43, %v1374_v43 }
 0x8aa   : > { %2573 = vmatmul.mubr.msk.bf16.vlgmr.msra.gmra.mxu1 %vm787_vm3, %v1376_v45 }
 0x8ab   : > { %2585 = vmatpush3.bf16.xpose.msra.mxu1 %v1544_v46  ;;  %2586 = vmatprep.mubr.msk.bf16.mxu1 %vm3051_vm0, %v3049_v6 }
 0x8ac   : > { %2596 = vmatprep.subr.bf16.mxu1 %v3049_v6 }
 0x8bc   : > { %1377 = vrot.lane.b32.xlu0 %v3300_v16, %s3053_s24 }
 0x8c0   : > { %1536 = vrot.lane.b32.xlu0 %v3304_v19, %s3054_s14 }
 0x92f   : > { %v1367_v47 = vpop.xlane.xlu0 %1366 }
 0x930   : > { %2825 = vrcp.f32 %v1367_v47 }
 0x933   : > { %v1378_v48 = vpop.permute.xlu0 %1377 }
 0x934   : > { %v1383_v49 = vsel %vm815_vm2, %v1378_v48, 0 }
 0x935   : > { %2565 = vmatpush3.bf16.msra.mxu0 %v1383_v49  ;;  %v2757_v49 = vld [vmem:[%s3215_s12 + $0x15c] ss:$24 sps:$4 sm:$0xff]  }
 0x936   : > { %2576 = vmatprep.subr.bf16.mxu0 %v3049_v6 }
 0x937   : > { %v1537_v50 = vpop.permute.xlu0 %1536 }
 0x938   : > { %2587 = vmatmul.mubr.msk.bf16.vlgmr.msra.gmra.mxu1 %vm694_vm1, %v1537_v50  ;;  %v2758_v50 = vld [vmem:[%s3215_s12 + $0x12c] ss:$24 sps:$4 sm:$0xff]  }
 0x939   : > { %2598 = vmatprep.mubr.msk.bf16.mxu1 %vm3051_vm0, %v3049_v6 }
 0x93d   : > { %v2826_v51 = vpop.eup %2825 }
 0x93e   : > { %v1373_v52 = vmul.f32 %v2826_v51, %v2822_v40 }
 0x940   : > { %v1375_v53 = vpack.c.bf16 %v1373_v52, %v1373_v52 }
 0x942   : > { %2567 = vmatmul.mubr.msk.bf16.vlgmr.msra.gmra.mxu0 %vm787_vm3, %v1375_v53 }
 0x943   : > { %2580 = vmatprep.mubr.msk.bf16.mxu0 %vm3051_vm0, %v3049_v6  ;;  %2577 = vmatpush3.bf16.msra.mxu0 %v2755_v59 }
 0x944   : > { %2578 = vmatprep.subr.bf16.mxu0 %v3049_v6 }
 0x947   : > { %2579 = vmatpush3.bf16.msra.mxu0 %v2756_v60 }
 0x948   : > { %2590 = vmatprep.subr.bf16.mxu0 %v3049_v6 }
 0x96a   : > { %v1467_v19 = vpop.f32.mrf.mxu1 }
 0x96c   : > { %v2574_v54 = vpop.f32.mrf.mxu1 }
 0x96e   : > { %v1470_v55 = vpop.f32.mrf.mxu1 }
 0x970   : > { %v2575_v58 = vpop.f32.mrf.mxu1 }
 0x9f8   : > { %v1580_v61 = vpop.f32.mrf.mxu1 }
 0x9f9   : > { %v1636_v62 = vsel %vm787_vm3, %v1580_v61, -inf }
 0x9fa   : > { %1637 = vmax.xlane.f32.xlu0 %v1636_v62  ;;  %v2588_v0 = vpop.f32.mrf.mxu1 }
 0x9fb   : > { %v2839_v0 = vld [vmem:[#allocation10] sm:$0xff] }
 0x9fc   : > { %v1583_v1 = vpop.f32.mrf.mxu1 }
 0x9fe   : > { %v2589_v2 = vpop.f32.mrf.mxu1 }
 0xa02   : > { %v1419_v4 = vpop.f32.mrf.mxu0 }
 0xa03   : > { %v1477_v7 = vpack.c.bf16 %v1467_v19, %v1419_v4 }
 0xa04   : > { %v2568_v9 = vpop.f32.mrf.mxu0 }
 0xa05   : > { %2581 = vmatmul.mubr.msk.bf16.vlgmr.msra.gmra.mxu0 %vm694_vm1, %v1477_v7  ;;  %v2840_v9 = vld [vmem:[#allocation10 + $0x8] sm:$0xff] }
 0xa06   : > { %2591 = vmatpush3.bf16.xpose.msra.mxu0 %v1594_v11  ;;  %v1422_v12 = vpop.f32.mrf.mxu0  ;;  %2592 = vmatprep.mubr.msk.bf16.mxu0 %vm3051_vm0, %v3049_v6 }
 0xa07   : > { %2602 = vmatprep.subr.bf16.mxu0 %v3049_v6 }
 0xa08   : > { %v2569_v13 = vpop.f32.mrf.mxu0 }
 0xa09   : > { %v2759_v13 = vld [vmem:[%s3215_s12 + $0x160] ss:$24 sps:$4 sm:$0xff]  }
 0xa0d   : > { %2593 = vmatmul.mubr.msk.bf16.vlgmr.msra.gmra.mxu0 %vm694_vm1, %v1587_v14  ;;  %v2761_v14 = vld [vmem:[%s3215_s12 + $0x164] ss:$24 sps:$4 sm:$0xff]  }
 0xa0e   : > { %2604 = vmatprep.mubr.msk.bf16.mxu0 %vm3051_vm0, %v3049_v6 }
 0xa83   : > { %v1638_v17 = vpop.xlane.xlu0 %1637 }
 0xa84   : > { %v1642_v18 = vsub.f32 %v1580_v61, %v1638_v17 }
 0xa86   : > { %v1644_v20 = vmul.f32 1.442695, %v1642_v18 }
 0xa88   : > { %2827 = vpow2.f32 %v1644_v20 }
 0xa95   : > { %v2828_v22 = vpop.eup %2827 }
 0xa96   : > { %v1648_v24 = vsel %vm787_vm3, %v2828_v22, 0.0 }
 0xa97   : > { %1649 = vadd.xlane.f32.xlu0 %v1648_v24 }
 0xac5   : > { %v1527_v26 = vpop.f32.mrf.mxu0 }
 0xac6   : > { %v1534_v28 = vadd.f32 %v1527_v26, %v1247_v25 }
 0xac7   : > { %v2582_v30 = vpop.f32.mrf.mxu0 }
 0xac8   : > { %v2764_v30 = vld [vmem:[%s3215_s12 + $0x134] ss:$24 sps:$4 sm:$0xff]  }
 0xac9   : > { %v1530_v31 = vpop.f32.mrf.mxu0 }
 0xaca   : > { %v1535_v23 = vadd.f32 %v1530_v31, %v1250_v15  ;;  %v2762_v15 = vld [vmem:[%s3215_s12 + $0x130] ss:$24 sps:$4 sm:$0xff]   ;;  %v2767_v31 = vld [vmem:[%s3215_s12 + $0x104] ss:$24 sps:$4 sm:$0xff]  }
 0xacb   : > { %v2583_v32 = vpop.f32.mrf.mxu0 }
 0xacc   : > { %v2770_v32 = vld [vmem:[%s3215_s12 + $0xd4] ss:$24 sps:$4 sm:$0xff]  }
 0xacd   : > { %v1630_v33 = vpop.f32.mrf.mxu0 }
 0xace   : > { %v1639_v34 = vsel %vm787_vm3, %v1630_v33, -inf }
 0xacf   : > { %1640 = vmax.xlane.f32.xlu1 %v1639_v34  ;;  %v2594_v35 = vpop.f32.mrf.mxu0  ;;  %v2773_v34 = vld [vmem:[%s3215_s12 + $0xa4] ss:$24 sps:$4 sm:$0xff]  }
 0xad0   : > { %v2771_v35 = vld [vmem:[%s3215_s12 + $0xa0] ss:$24 sps:$4 sm:$0xff]  }
 0xad1   : > { %v1633_v36 = vpop.f32.mrf.mxu0 }
 0xad2   : > { %v2776_v36 = vld [vmem:[%s3215_s12 + $0x74] ss:$24 sps:$4 sm:$0xff]  }
 0xad3   : > { %v2595_v37 = vpop.f32.mrf.mxu0 }
 0xad4   : > { %v2774_v37 = vld [vmem:[%s3215_s12 + $0x70] ss:$24 sps:$4 sm:$0xff]  }
 0xae0   : > { %1708 = vrot.lane.b32.xlu1 %v3307_v21, %s3054_s14 }
 0xb20   : > { %v1650_v41 = vpop.xlane.xlu0 %1649 }
 0xb58   : > { %v1641_v5 = vpop.xlane.xlu1 %1640 }
 0xb59   : > { %v1643_v27 = vsub.f32 %v1630_v33, %v1641_v5  ;;  %v2768_v33 = vld [vmem:[%s3215_s12 + $0xd0] ss:$24 sps:$4 sm:$0xff]   ;;  %v2779_v5 = vld [vmem:[%s3215_s12 + $0x44] ss:$24 sps:$4 sm:$0xff]  }
 0xb5b   : > { %v1646_v38 = vmul.f32 1.442695, %v1643_v27  ;;  %v2777_v27 = vld [vmem:[%s3215_s12 + $0x40] ss:$24 sps:$4 sm:$0xff]  }
 0xb5c   : > { %v1709_v39 = vpop.permute.xlu1 %1708 }
 0xb5d   : > { %2829 = vpow2.f32 %v1646_v38  ;;  %v1714_v10 = vsel %vm815_vm2, %v1709_v39, 0  ;;  %v2782_v38 = vld [vmem:[%s3215_s12 + $0x14] ss:$24 sps:$4 sm:$0xff]   ;;  %v2780_v39 = vld [vmem:[%s3215_s12 + $0x10] ss:$24 sps:$4 sm:$0xff]  }
 0xb5e   : > { %2603 = vmatpush3.bf16.msra.mxu0 %v1714_v10  ;;  %2831 = vrcp.f32 %v1650_v41  ;;  %v2783_v10 = vld [vmem:[%s3221_s15 + $0x78] sm:$0xff]   ;;  %v2786_v41 = vld [vmem:[%s3221_s15 + $0x30] sm:$0xff]  }
 0xb5f   : > { %1959 = vmatprep.subr.bf16.mxu0 %v2761_v14 }
 0xb6a   : > { %v2830_v8 = vpop.eup %2829 }
 0xb6b   : > { %v1651_v40 = vsel %vm787_vm3, %v2830_v8, 0.0  ;;  %v2832_v42 = vpop.eup %2831 }
 0xb6c   : > { %1652 = vadd.xlane.f32.xlu0 %v1651_v40  ;;  %v1656_v43 = vmul.f32 %v2832_v42, %v2828_v22  ;;  %v2785_v40 = vld [vmem:[%s3221_s15 + $0x70] sm:$0xff]   ;;  %v2787_v42 = vld [vmem:[%s3221_s15 + $0x68] sm:$0xff]  }
 0xb6e   : > { %v1658_v46 = vpack.c.bf16 %v1656_v43, %v1656_v43  ;;  %v2789_v43 = vld [vmem:[%s3221_s15 + $0x60] sm:$0xff]  }
 0xb82   : > { %1660 = vrot.lane.b32.xlu0 %v3300_v16, %s3054_s14 }
 0xbf5   : > { %v1653_v21 = vpop.xlane.xlu0 %1652 }
 0xbf6   : > { %2833 = vrcp.f32 %v1653_v21  ;;  %v2788_v21 = vld [vmem:[%s3221_s15 + $0x28] sm:$0xff]  }
 0xbf9   : > { %v1661_v44 = vpop.permute.xlu0 %1660 }
 0xbfa   : > { %v1666_v45 = vsel %vm815_vm2, %v1661_v44, 0  ;;  %v2790_v44 = vld [vmem:[%s3221_s15 + $0x20] sm:$0xff]  }
 0xbfb   : > { %2597 = vmatpush3.bf16.msra.mxu1 %v1666_v45  ;;  %v2791_v45 = vld [vmem:[%s3221_s15 + $0x58] sm:$0xff]  }
 0xbfc   : > { %2608 = vmatprep.subr.bf16.mxu1 %v3049_v6 }
 0xbfe   : > { %2599 = vmatmul.mubr.msk.bf16.vlgmr.msra.gmra.mxu1 %vm787_vm3, %v1658_v46  ;;  %v2792_v46 = vld [vmem:[%s3221_s15 + $0x18] sm:$0xff]  }
 0xbff   : > { %2612 = vmatprep.mubr.msk.bf16.mxu1 %vm3051_vm0, %v3049_v6  ;;  %2609 = vmatpush3.bf16.msra.mxu1 %v2757_v49 }
 0xc00   : > { %2610 = vmatprep.subr.bf16.mxu1 %v3049_v6  ;;  %v2352_v6 = vld [vmem:[%s3223_s13 + $0x3] ss:$0 sm:$0xff] }
 0xc03   : > { %v2834_v16 = vpop.eup %2833  ;;  %2611 = vmatpush3.bf16.msra.mxu1 %v2758_v50 }
 0xc04   : > { %v1657_v47 = vmul.f32 %v2834_v16, %v2830_v8  ;;  %v2784_v8 = vld [vmem:[%s3221_s15 + $0x38] sm:$0xff]   ;;  %2446 = vmatprep.subr.bf16.mxu1 %v2783_v10 }
 0xc06   : > { %v1659_v48 = vpack.c.bf16 %v1657_v47, %v1657_v47 }
 0xc08   : > { %2605 = vmatmul.mubr.msk.bf16.vlgmr.msra.gmra.mxu0 %vm787_vm3, %v1659_v48 }
 0xc09   : > { %1991 = vmatprep.mubr.bf16.mxu0 %v3050_v29  ;;  %1960 = vmatpush1.bf16.msra.mxu0 %v2759_v13 }
 0xc0a   : > { %1961 = vmatprep.subr.bf16.mxu0 %v2764_v30 }
 0xc0d   : > { %1962 = vmatpush1.bf16.msra.mxu0 %v2762_v15 }
 0xc0e   : > { %1963 = vmatprep.subr.bf16.mxu0 %v2767_v31 }
 0xcbe   : > { %v1702_v51 = vpop.f32.mrf.mxu1 }
 0xcc0   : > { %v2600_v52 = vpop.f32.mrf.mxu1 }
 0xcc2   : > { %v1705_v53 = vpop.f32.mrf.mxu1 }
 0xcc4   : > { %v2601_v19 = vpop.f32.mrf.mxu1 }
 0xcc5   : > { %v2353_v19 = vld [vmem:[%s3223_s13 + $0x6] ss:$0 sm:$0xff] }
 0xcc8   : > { %v1750_v54 = vpop.f32.mrf.mxu0 }
 0xcc9   : > { %v1760_v55 = vpack.c.bf16 %v1750_v54, %v1702_v51 }
 0xcca   : > { %v2606_v58 = vpop.f32.mrf.mxu0 }
 0xccb   : > { %2613 = vmatmul.mubr.msk.bf16.vlgmr.msra.gmra.mxu1 %vm694_vm1, %v1760_v55 }
 0xccc   : > { %v1753_v59 = vpop.f32.mrf.mxu0  ;;  %2447 = vmatpush3.bf16.msra.mxu1 %v2784_v8 }
 0xccd   : > { %2448 = vmatprep.subr.bf16.mxu1 %v2785_v40  ;;  %v2354_v59 = vld [vmem:[%s3223_s13 + $0x7] ss:$0 sm:$0xff] }
 0xcce   : > { %v2607_v60 = vpop.f32.mrf.mxu0 }
 0xcd0   : > { %2449 = vmatpush3.bf16.msra.mxu1 %v2786_v41 }
 0xcd1   : > { %2450 = vmatprep.subr.bf16.mxu1 %v2787_v42 }
 0xcd4   : > { %2451 = vmatpush3.bf16.msra.mxu1 %v2788_v21 }
 0xcd5   : > { %2452 = vmatprep.subr.bf16.mxu1 %v2789_v43 }
 0xcd8   : > { %2453 = vmatpush3.bf16.msra.mxu1 %v2790_v44 }
 0xcd9   : > { %2454 = vmatprep.subr.bf16.mxu1 %v2791_v45 }
 0xcdc   : > { %2455 = vmatpush3.bf16.msra.mxu1 %v2792_v46 }
 0xd8b   : > { %v1810_v29 = vpop.f32.mrf.mxu1 }
 0xd8c   : > { %v1817_v61 = vadd.f32 %v1810_v29, %v1534_v28 }
 0xd8d   : > { %v2614_v62 = vpop.f32.mrf.mxu1 }
 0xd8e   : > { %v1819_v1 = vadd.f32 %v2839_v0, %v1817_v61  ;;  %v2794_v0 = vld [vmem:[%s3221_s15 + $0x10] sm:$0xff]  }
 0xd8f   : > { %v1813_v2 = vpop.f32.mrf.mxu1 }
 0xd90   : > { %v1818_v3 = vadd.f32 %v1813_v2, %v1535_v23  ;;  %v3488_v4 = vadd.f32 %v2352_v6, %v1819_v1  ;;  %v2765_v23 = vld [vmem:[%s3215_s12 + $0x100] ss:$24 sps:$4 sm:$0xff]   ;;  %v2795_v1 = vld [vmem:[%s3221_s15 + $0x48] sm:$0xff]  }
 0xd91   : > { %v2615_v7 = vpop.f32.mrf.mxu1  ;;  %1964 = vmatpush1.bf16.msra.mxu0 %v2765_v23  ;;  %v2796_v2 = vld [vmem:[%s3221_s15 + $0x8] sm:$0xff]  }
 0xd92   : > { %v1820_v11 = vadd.f32 %v2840_v9, %v1818_v3  ;;  %1829 = vadd.xlane.f32.xlu1 %v3488_v4  ;;  %1965 = vmatprep.subr.bf16.mxu0 %v2770_v32  ;;  %v2797_v3 = vld [vmem:[%s3221_s15 + $0x40] sm:$0xff]   ;;  %v418_v9 = vld [vmem:[%s3223_s13 + $0x8] sm:$0x3] }
 0xd93   : > { %v2798_v7 = vld [vmem:[%s3221_s15] sm:$0xff]   ;;  %v1876_v13 = vrot.slane %v418_v9, %v467_v57  ;;  %v1872_v14 = vrot.slane %v418_v9, %v463_v63 }
 0xd94   : > { %v3491_v12 = vadd.f32 %v2352_v6, %v1820_v11  ;;  %v2793_v6 = vld [vmem:[%s3221_s15 + $0x50] sm:$0xff]  }
 0xd95   : > { %1966 = vmatpush1.bf16.msra.mxu0 %v2768_v33  ;;  %2456 = vmatprep.subr.bf16.mxu1 %v2793_v6 }
 0xd96   : > { %1831 = vadd.xlane.f32.xlu0 %v3491_v12  ;;  %1967 = vmatprep.subr.bf16.mxu0 %v2773_v34 }
 0xd97   : > { %2457 = vmatpush3.bf16.msra.mxu1 %v2794_v0 }
 0xd98   : > { %2458 = vmatprep.subr.bf16.mxu1 %v2795_v1 }
 0xd99   : > { %1968 = vmatpush1.bf16.msra.mxu0 %v2771_v35 }
 0xd9a   : > { %1969 = vmatprep.subr.bf16.mxu0 %v2776_v36 }
 0xd9b   : > { %2459 = vmatpush3.bf16.msra.mxu1 %v2796_v2 }
 0xd9c   : > { %2460 = vmatprep.subr.bf16.mxu1 %v2797_v3 }
 0xd9d   : > { %1970 = vmatpush1.bf16.msra.mxu0 %v2774_v37 }
 0xd9e   : > { %1971 = vmatprep.subr.bf16.mxu0 %v2779_v5 }
 0xd9f   : > { %2461 = vmatpush3.bf16.msra.mxu1 %v2798_v7 }
 0xda1   : > { %1972 = vmatpush1.bf16.msra.mxu0 %v2777_v27 }
 0xda2   : > { %1973 = vmatprep.subr.bf16.mxu0 %v2782_v38 }
 0xda5   : > { %1974 = vmatpush1.bf16.msra.mxu0 %v2780_v39 }
 0xe1b   : > { %v1830_v17 = vpop.xlane.xlu1 %1829 }
 0xe1c   : > { %v1833_v18 = vmul.f32 0.0078125, %v1830_v17 }
 0xe1e   : > { %v3497_v20 = vsub.f32 %v3488_v4, %v1833_v18 }
 0xe1f   : > { %v1832_v22 = vpop.xlane.xlu0 %1831 }
 0xe20   : > { %v1834_v24 = vmul.f32 0.0078125, %v1832_v22  ;;  %v1837_v25 = vmul.f32 %v3497_v20, %v3497_v20 }
 0xe22   : > { %v3502_v26 = vsub.f32 %v3491_v12, %v1834_v24  ;;  %1839 = vadd.xlane.f32.xlu0 %v1837_v25 }
 0xe24   : > { %v1838_v28 = vmul.f32 %v3502_v26, %v3502_v26 }
 0xe26   : > { %1841 = vadd.xlane.f32.xlu1 %v1838_v28 }
 0xeab   : > { %v1840_v16 = vpop.xlane.xlu0 %1839 }
 0xeac   : > { %v1843_v47 = vmul.f32 0.0078125, %v1840_v16 }
 0xeae   : > { %v1845_v48 = vadd.f32 1e-05, %v1843_v47 }
 0xeaf   : > { %v1842_v49 = vpop.xlane.xlu1 %1841 }
 0xeb0   : > { %2835 = vrsqrt.f32 %v1845_v48  ;;  %v1844_v50 = vmul.f32 0.0078125, %v1842_v49 }
 0xeb2   : > { %v1846_v51 = vadd.f32 1e-05, %v1844_v50 }
 0xeb4   : > { %2837 = vrsqrt.f32 %v1846_v51 }
 0xebd   : > { %v2836_v52 = vpop.eup %2835 }
 0xebe   : > { %v1849_v53 = vmul.f32 %v2836_v52, %v3497_v20 }
 0xec0   : > { %v1857_v58 = vmul.f32 %v2353_v19, %v1849_v53 }
 0xec1   : > { %v2838_v54 = vpop.eup %2837 }
 0xec2   : > { %v1850_v55 = vmul.f32 %v2838_v54, %v3502_v26  ;;  %v1865_v29 = vadd.f32 %v2354_v59, %v1857_v58 }
 0xec4   : > { %v1858_v60 = vmul.f32 %v2353_v19, %v1850_v55 }
 0xec6   : > { %v1866_v61 = vadd.f32 %v2354_v59, %v1858_v60 }
 0xec8   : > { %v1867_v62 = vpack.c.bf16 %v1866_v61, %v1865_v29 }
 0xeca   : > { %1992 = vmatmul.mubr.bf16.vlgmr.msra.gmra.mxu0 %v1867_v62 }
 0xf8a   : > { %v1993_v11 = vpop.f32.mrf.mxu0 }
 0xf8b   : > { %v1994_v24 = vadd.f32 %v1993_v11, %v1872_v14 }
 0xf8c   : > { %v1995_v17 = vpop.f32.mrf.mxu0 }
 0xf8d   : > { %v1996_v20 = vadd.f32 %v1995_v17, %v1876_v13  ;;  %v2002_v31 = vmax.f32 %v1994_v24, 0.0 }
 0xf8e   : > { %v1997_v18 = vpop.f32.mrf.mxu0 }
 0xf8f   : > { %v1998_v22 = vadd.f32 %v1997_v18, %v1872_v14  ;;  %v2003_v30 = vmax.f32 %v1996_v20, 0.0 }
 0xf90   : > { %v1999_v25 = vpop.f32.mrf.mxu0 }
 0xf91   : > { %v2000_v26 = vadd.f32 %v1999_v25, %v1876_v13  ;;  %v2004_v28 = vmax.f32 %v1998_v22, 0.0 }
 0xf93   : > { %v2005_v15 = vmax.f32 %v2000_v26, 0.0  ;;  %v2006_v32 = vpack.c.bf16 %v2004_v28, %v2002_v31 }
 0xf95   : > { %v2007_v23 = vpack.c.bf16 %v2005_v15, %v2003_v30 }
 0xf97   : > { %2142 = vmatprep.mubr.bf16.mxu1 %v2007_v23 }
 0xf98   : > { %2143 = vmatmul.mubr.bf16.vlgmr.msra.gmra.mxu1 %v2006_v32 }
0x1058   : > { %v2462_v57 = vpop.f32.mrf.mxu1 }
0x105a   : > { %v2463_v63 = vpop.f32.mrf.mxu1 }
0x105b   : > { %v2464_v33 = vadd.f32 %v2463_v63, %v2462_v57 }
0x105c   : > { %v2465_v34 = vpop.f32.mrf.mxu1 }
0x105d   : > { %v2145_v35 = vadd.f32 %v2464_v33, %v2371_v56 }
0x105e   : > { %v2466_v36 = vpop.f32.mrf.mxu1 }
0x105f   : > { %v2151_v37 = vadd.f32 %v2145_v35, %v3488_v4  ;;  %v2467_v5 = vadd.f32 %v2466_v36, %v2465_v34 }
0x1061   : > { %2153 = vst [vmem:[#allocation10] sm:$0xff] %v2151_v37  ;;  %v2148_v27 = vadd.f32 %v2467_v5, %v2371_v56 }
0x1063   : > { %v2152_v38 = vadd.f32 %v2148_v27, %v3491_v12 }
0x1065   : > { %2154 = vst [vmem:[#allocation10 + $0x8] sm:$0xff] %v2152_v38 }
0x1066   : > { %2964 = shalt.err (!%p2961_p9)
}
0x1067   : > { %s3056_s5 = smov 128   ;;  %s3057_s7 = smov 8  }
0x1068   : > { %2633 = dma.vmem_to_hbm [thread:$0]  (%p2653_p5), %s2165_s28, 256, %s3582_s4, [#allocation4], %s3056_s5, %s3056_s5, %s3057_s7  }
0x1069   : > { %3012 = dma.done.wait (%p2653_p5), [#allocation4], 256  }
0x106a   : > { %3014 = vsyncadd (%p2653_p5), [#allocation4], 4294967040 }
0x106b PF: > { %s22_s20 = sadd.s32 1, %s3037_s20   ;;  %s3594_s15 = smov %s3021_s16 }
0x106c   : > { %p19_p11 = scmp.ge.s32.totalorder %s22_s20, 4   ;;  %s3595_s16 = smov %s3025_s17 }
0x106d   : > { %s3596_s17 = smov %s3129_s27  ;;  %s3597_s18 = smov %s3033_s19 }
0x106e   : > { %s3598_s19 = smov %s3600_s21  ;;  %21 = sbr.rel (!%p19_p11) target bundleno = 11 (0xb), region = 108 }
0x1073   :  { %2180 = vsyncpa [#allocation3], 1 }
0x1074   :  { %2182 = vsyncpa [#allocation3 + $0x1], 1 }
0x1075   :  { %2183 = vsyncpa [#allocation6], 1 }
0x1076   :  { %2185 = vsyncpa [#allocation6 + $0x1], 1 }
0x1077   :  { %2186 = vsyncpa [#allocation9], 1 }
0x1078   :  { %2188 = vsyncpa [#allocation9 + $0x1], 1 }
0x1079   :  { %2189 = vsyncpa [#allocation4], 1 }
0x107a   :  { %2191 = vsyncpa [#allocation4 + $0x1], 1 }

</bundles_post_ra>
